<compile_context>
chip_gen: v7x
topology: tpu7x:2x2x1
jax: 0.10.0
libtpu: 0.0.40
codegen_flags: <defaults>
</compile_context>

<pallas_src>
import jax
import jax.numpy as jnp
from jax.experimental import pallas as pl
from jax.experimental.pallas import tpu as pltpu


def _round_up(x, m):
    return (x + m - 1) // m * m


def _qkv_conv3x3_kernel(x_ref, w_ref, b_ref, o_ref, xpad_ref, pat_ref):
    """One batch element, one row-tile of the fused 3x3 conv.

    x_ref   : (1, H, W, Cin)    bf16  full image of this batch element
    w_ref   : (9*Cin, Cp)       bf16  fused, lane-padded conv weights
    b_ref   : (1, Cp)           f32   fused, lane-padded bias
    o_ref   : (1, TH, W, Cp)    f32   output row-tile
    xpad_ref: (H+2, W+2, Cin)   bf16  scratch: zero-halo padded input
    pat_ref : (TH, W, 9*Cin)    bf16  scratch: im2col patches for this tile
    """
    _, H, W, Cin = x_ref.shape
    _, TH, _, Cp = o_ref.shape
    K = w_ref.shape[0]                      # 9 * Cin

    t = pl.program_id(1)                    # row-tile index
    r0 = pl.multiple_of(t * TH, TH)         # first output row of this tile

    # Zero-halo copy of the input in VMEM (replaces the old wrapper jnp.pad,
    # which cost an extra HBM round trip of the whole activation).
    xpad_ref[...] = jnp.zeros_like(xpad_ref)
    xpad_ref[1:H + 1, 1:W + 1, :] = x_ref[0]

    # im2col for this row tile: tap (dy, dx) lands in lane block
    # [(3*dy+dx)*Cin, (3*dy+dx+1)*Cin), matching the (dy, dx, cin)-major
    # flattening of the fused weights.
    for dy in range(3):
        for dx in range(3):
            tap = 3 * dy + dx
            pat_ref[:, :, tap * Cin:(tap + 1) * Cin] = (
                xpad_ref[pl.ds(r0 + dy, TH), dx:dx + W, :])

    # Single lane-dense GEMM over the fused K = 9*Cin contraction, f32 acc.
    patches = pat_ref[...].reshape(TH * W, K)
    acc = jnp.dot(patches, w_ref[...], preferred_element_type=jnp.float32)
    acc = acc + b_ref[...]                  # f32 bias, broadcast over rows

    # Dense, unmasked store of the full 128-lane-wide output tile.
    o_ref[...] = acc.reshape(1, TH, W, Cp).astype(o_ref.dtype)


def fused_conv3x3(x_nhwc, w_fused, b_fused, *, row_tile=8):
    """x_nhwc: (N,H,W,Cin) bf16; w_fused: (9*Cin, Cp) bf16; b_fused: (1, Cp) f32."""
    N, H, W, Cin = x_nhwc.shape
    K, Cp = w_fused.shape
    TH = row_tile if H % row_tile == 0 else H
    n_row_tiles = H // TH

    return pl.pallas_call(
        _qkv_conv3x3_kernel,
        out_shape=jax.ShapeDtypeStruct((N, H, W, Cp), jnp.float32),
        grid_spec=pltpu.PrefetchScalarGridSpec(
            num_scalar_prefetch=0,
            grid=(N, n_row_tiles),
            in_specs=[
                # Full image per batch element; block index ignores t, so the
                # input is only DMA'd when n changes.
                pl.BlockSpec((1, H, W, Cin), lambda n, t: (n, 0, 0, 0)),
                # Weights / bias: constant index map -> resident, single DMA.
                pl.BlockSpec((K, Cp), lambda n, t: (0, 0)),
                pl.BlockSpec((1, Cp), lambda n, t: (0, 0)),
            ],
            out_specs=pl.BlockSpec((1, TH, W, Cp), lambda n, t: (n, t, 0, 0)),
            scratch_shapes=[
                pltpu.VMEM((H + 2, W + 2, Cin), x_nhwc.dtype),
                pltpu.VMEM((TH, W, K), x_nhwc.dtype),
            ],
        ),
        compiler_params=pltpu.CompilerParams(
            dimension_semantics=("parallel", "parallel")),
    )(x_nhwc, w_fused, b_fused)


class QueryKeyValuePallas:
    """JAX/Pallas equivalent of the PyTorch QueryKeyValue module."""

    def __init__(self, indim, keydim, valdim, key):
        self.indim, self.keydim, self.valdim = indim, keydim, valdim
        k1, k2, k3, k4, k5, k6 = jax.random.split(key, 6)

        def winit(k, cout):   # HWIO, shapes match nn.Conv2d(indim, cout, 3)
            return 0.1 * jax.random.normal(k, (3, 3, indim, cout), jnp.float32)

        def binit(k, cout):
            return 0.01 * jax.random.normal(k, (cout,), jnp.float32)

        self.w_q, self.b_q = winit(k1, keydim), binit(k2, keydim)
        self.w_k, self.b_k = winit(k3, keydim), binit(k4, keydim)
        self.w_v, self.b_v = winit(k5, valdim), binit(k6, valdim)

        # Fuse q/k/v weights along Cout, zero-pad Cout to a multiple of 128
        # (lane-dense MXU N-dim and stores), flatten the 3x3xCin taps into the
        # K axis, cast to bf16.  Done once at init time.
        self.cout = 2 * keydim + valdim
        self.cout_padded = _round_up(self.cout, 128)
        pad_c = self.cout_padded - self.cout
        w_all = jnp.concatenate([self.w_q, self.w_k, self.w_v], axis=-1)
        w_all = jnp.pad(w_all, ((0, 0), (0, 0), (0, 0), (0, pad_c)))
        self.w_fused = w_all.reshape(9 * indim, self.cout_padded).astype(jnp.bfloat16)
        b_all = jnp.concatenate([self.b_q, self.b_k, self.b_v])
        self.b_fused = jnp.pad(b_all, (0, pad_c)).reshape(1, self.cout_padded)

    def __call__(self, x_nchw):
        # NCHW -> NHWC, bf16 activations (halves DMA bytes, doubles MXU rate).
        x_nhwc = jnp.transpose(x_nchw, (0, 2, 3, 1)).astype(jnp.bfloat16)
        y = fused_conv3x3(x_nhwc, self.w_fused, self.b_fused)   # (N,H,W,Cp) f32
        kd, vd = self.keydim, self.valdim
        y = y[..., :self.cout]                 # drop lane padding
        y = jnp.transpose(y, (0, 3, 1, 2))     # single NHWC -> NCHW transpose
        q = y[:, :kd]
        k = y[:, kd:2 * kd]
        v = y[:, 2 * kd:2 * kd + vd]
        return q, k, v


def _reference(x_nchw, mod):
    """Pure-JAX reference (same bf16 operand / f32 accumulation numerics)."""
    def conv(x, w_hwio, b):
        w_oihw = jnp.transpose(w_hwio, (3, 2, 0, 1)).astype(jnp.bfloat16)
        y = jax.lax.conv_general_dilated(
            x.astype(jnp.bfloat16), w_oihw, window_strides=(1, 1),
            padding=((1, 1), (1, 1)),
            dimension_numbers=("NCHW", "OIHW", "NCHW"),
            preferred_element_type=jnp.float32)
        return y + b[None, :, None, None]
    return (conv(x_nchw, mod.w_q, mod.b_q),
            conv(x_nchw, mod.w_k, mod.b_k),
            conv(x_nchw, mod.w_v, mod.b_v))


if __name__ == "__main__":
    key = jax.random.PRNGKey(0)
    k_x, k_p = jax.random.split(key)

    N, Cin, H, W = 2, 4, 16, 16
    keydim, valdim = 8, 8
    x = jax.random.normal(k_x, (N, Cin, H, W), jnp.float32)

    mod = QueryKeyValuePallas(Cin, keydim, valdim, k_p)
    q, k, v = mod(x)
    jax.block_until_ready((q, k, v))

    qr, kr, vr = _reference(x, mod)
    assert q.shape == (N, keydim, H, W)
    assert k.shape == (N, keydim, H, W)
    assert v.shape == (N, valdim, H, W)
    assert jnp.allclose(q, qr, atol=1e-2, rtol=1e-2)
    assert jnp.allclose(k, kr, atol=1e-2, rtol=1e-2)
    assert jnp.allclose(v, vr, atol=1e-2, rtol=1e-2)

    print("KERNEL_OK")
</pallas_src>

<mosaic_0001>
module attributes {stable_mosaic.version = 11 : i64} {
  func.func @_qkv_conv3x3_kernel(%arg0: i32, %arg1: i32, %arg2: memref<1x16x16x4xbf16, #tpu.memory_space<vmem>>, %arg3: memref<36x128xbf16, #tpu.memory_space<vmem>>, %arg4: memref<1x128xf32, #tpu.memory_space<vmem>>, %arg5: memref<1x8x16x128xf32, #tpu.memory_space<vmem>>, %arg6: memref<18x18x4xbf16, #tpu.memory_space<vmem>>, %arg7: memref<8x16x36xbf16, #tpu.memory_space<vmem>>) attributes {dimension_semantics = [#tpu.dimension_semantics<parallel>, #tpu.dimension_semantics<parallel>], iteration_bounds = array<i64: 2, 2>, scalar_prefetch = 0 : i64, scratch_operands = 2 : i64, tpu.core_type = #tpu.core_type<tc>, window_params = [{transform_indices = @transform_0, window_bounds = array<i64: 1, 16, 16, 4>}, {pipeline_mode = #tpu.pipeline_mode<synchronous>, transform_indices = @transform_1, window_bounds = array<i64: 36, 128>}, {pipeline_mode = #tpu.pipeline_mode<synchronous>, transform_indices = @transform_2, window_bounds = array<i64: 1, 128>}, {transform_indices = @transform_3, window_bounds = array<i64: 1, 8, 16, 128>}]} {
    %c8_i32 = arith.constant 8 : i32
    %0 = arith.muli %arg1, %c8_i32 : i32
    %1 = tpu.assume_multiple %0, 8 : i32
    %cst = arith.constant 0.000000e+00 : bf16
    %2 = vector.broadcast %cst : bf16 to vector<18x18x4xbf16>
    %c0 = arith.constant 0 : index
    %c0_0 = arith.constant 0 : index
    %c0_1 = arith.constant 0 : index
    %3 = vector.load %arg6[%c0, %c0_0, %c0_1] : memref<18x18x4xbf16, #tpu.memory_space<vmem>>, vector<18x18x4xbf16>
    tpu.vector_store %arg6[%c0, %c0_0, %c0_1], %2 {strides = array<i32>} : memref<18x18x4xbf16, #tpu.memory_space<vmem>>, vector<18x18x4xbf16>,
    %c0_2 = arith.constant 0 : index
    %c0_3 = arith.constant 0 : index
    %c0_4 = arith.constant 0 : index
    %c0_5 = arith.constant 0 : index
    %4 = vector.load %arg2[%c0_2, %c0_3, %c0_4, %c0_5] : memref<1x16x16x4xbf16, #tpu.memory_space<vmem>>, vector<1x16x16x4xbf16>
    %5 = vector.shape_cast %4 : vector<1x16x16x4xbf16> to vector<16x16x4xbf16>
    %c1 = arith.constant 1 : index
    %c1_6 = arith.constant 1 : index
    %c0_7 = arith.constant 0 : index
    %6 = vector.load %arg6[%c1, %c1_6, %c0_7] : memref<18x18x4xbf16, #tpu.memory_space<vmem>>, vector<16x16x4xbf16>
    tpu.vector_store %arg6[%c1, %c1_6, %c0_7], %5 {strides = array<i32>} : memref<18x18x4xbf16, #tpu.memory_space<vmem>>, vector<16x16x4xbf16>,
    %c0_i32 = arith.constant 0 : i32
    %7 = arith.addi %1, %c0_i32 : i32
    %8 = arith.index_cast %7 : i32 to index
    %c0_8 = arith.constant 0 : index
    %c0_9 = arith.constant 0 : index
    %9 = vector.load %arg6[%8, %c0_8, %c0_9] : memref<18x18x4xbf16, #tpu.memory_space<vmem>>, vector<8x16x4xbf16>
    %c0_10 = arith.constant 0 : index
    %c0_11 = arith.constant 0 : index
    %c0_12 = arith.constant 0 : index
    %10 = vector.load %arg7[%c0_10, %c0_11, %c0_12] : memref<8x16x36xbf16, #tpu.memory_space<vmem>>, vector<8x16x4xbf16>
    tpu.vector_store %arg7[%c0_10, %c0_11, %c0_12], %9 {strides = array<i32>} : memref<8x16x36xbf16, #tpu.memory_space<vmem>>, vector<8x16x4xbf16>,
    %c0_i32_13 = arith.constant 0 : i32
    %11 = arith.addi %1, %c0_i32_13 : i32
    %12 = arith.index_cast %11 : i32 to index
    %c1_14 = arith.constant 1 : index
    %c0_15 = arith.constant 0 : index
    %13 = vector.load %arg6[%12, %c1_14, %c0_15] : memref<18x18x4xbf16, #tpu.memory_space<vmem>>, vector<8x16x4xbf16>
    %c0_16 = arith.constant 0 : index
    %c0_17 = arith.constant 0 : index
    %c4 = arith.constant 4 : index
    %14 = vector.load %arg7[%c0_16, %c0_17, %c4] : memref<8x16x36xbf16, #tpu.memory_space<vmem>>, vector<8x16x4xbf16>
    tpu.vector_store %arg7[%c0_16, %c0_17, %c4], %13 {strides = array<i32>} : memref<8x16x36xbf16, #tpu.memory_space<vmem>>, vector<8x16x4xbf16>,
    %c0_i32_18 = arith.constant 0 : i32
    %15 = arith.addi %1, %c0_i32_18 : i32
    %16 = arith.index_cast %15 : i32 to index
    %c2 = arith.constant 2 : index
    %c0_19 = arith.constant 0 : index
    %17 = vector.load %arg6[%16, %c2, %c0_19] : memref<18x18x4xbf16, #tpu.memory_space<vmem>>, vector<8x16x4xbf16>
    %c0_20 = arith.constant 0 : index
    %c0_21 = arith.constant 0 : index
    %c8 = arith.constant 8 : index
    %18 = vector.load %arg7[%c0_20, %c0_21, %c8] : memref<8x16x36xbf16, #tpu.memory_space<vmem>>, vector<8x16x4xbf16>
    tpu.vector_store %arg7[%c0_20, %c0_21, %c8], %17 {strides = array<i32>} : memref<8x16x36xbf16, #tpu.memory_space<vmem>>, vector<8x16x4xbf16>,
    %c1_i32 = arith.constant 1 : i32
    %19 = arith.addi %1, %c1_i32 : i32
    %20 = arith.index_cast %19 : i32 to index
    %c0_22 = arith.constant 0 : index
    %c0_23 = arith.constant 0 : index
    %21 = vector.load %arg6[%20, %c0_22, %c0_23] : memref<18x18x4xbf16, #tpu.memory_space<vmem>>, vector<8x16x4xbf16>
    %c0_24 = arith.constant 0 : index
    %c0_25 = arith.constant 0 : index
    %c12 = arith.constant 12 : index
    %22 = vector.load %arg7[%c0_24, %c0_25, %c12] : memref<8x16x36xbf16, #tpu.memory_space<vmem>>, vector<8x16x4xbf16>
    tpu.vector_store %arg7[%c0_24, %c0_25, %c12], %21 {strides = array<i32>} : memref<8x16x36xbf16, #tpu.memory_space<vmem>>, vector<8x16x4xbf16>,
    %c1_i32_26 = arith.constant 1 : i32
    %23 = arith.addi %1, %c1_i32_26 : i32
    %24 = arith.index_cast %23 : i32 to index
    %c1_27 = arith.constant 1 : index
    %c0_28 = arith.constant 0 : index
    %25 = vector.load %arg6[%24, %c1_27, %c0_28] : memref<18x18x4xbf16, #tpu.memory_space<vmem>>, vector<8x16x4xbf16>
    %c0_29 = arith.constant 0 : index
    %c0_30 = arith.constant 0 : index
    %c16 = arith.constant 16 : index
    %26 = vector.load %arg7[%c0_29, %c0_30, %c16] : memref<8x16x36xbf16, #tpu.memory_space<vmem>>, vector<8x16x4xbf16>
    tpu.vector_store %arg7[%c0_29, %c0_30, %c16], %25 {strides = array<i32>} : memref<8x16x36xbf16, #tpu.memory_space<vmem>>, vector<8x16x4xbf16>,
    %c1_i32_31 = arith.constant 1 : i32
    %27 = arith.addi %1, %c1_i32_31 : i32
    %28 = arith.index_cast %27 : i32 to index
    %c2_32 = arith.constant 2 : index
    %c0_33 = arith.constant 0 : index
    %29 = vector.load %arg6[%28, %c2_32, %c0_33] : memref<18x18x4xbf16, #tpu.memory_space<vmem>>, vector<8x16x4xbf16>
    %c0_34 = arith.constant 0 : index
    %c0_35 = arith.constant 0 : index
    %c20 = arith.constant 20 : index
    %30 = vector.load %arg7[%c0_34, %c0_35, %c20] : memref<8x16x36xbf16, #tpu.memory_space<vmem>>, vector<8x16x4xbf16>
    tpu.vector_store %arg7[%c0_34, %c0_35, %c20], %29 {strides = array<i32>} : memref<8x16x36xbf16, #tpu.memory_space<vmem>>, vector<8x16x4xbf16>,
    %c2_i32 = arith.constant 2 : i32
    %31 = arith.addi %1, %c2_i32 : i32
    %32 = arith.index_cast %31 : i32 to index
    %c0_36 = arith.constant 0 : index
    %c0_37 = arith.constant 0 : index
    %33 = vector.load %arg6[%32, %c0_36, %c0_37] : memref<18x18x4xbf16, #tpu.memory_space<vmem>>, vector<8x16x4xbf16>
    %c0_38 = arith.constant 0 : index
    %c0_39 = arith.constant 0 : index
    %c24 = arith.constant 24 : index
    %34 = vector.load %arg7[%c0_38, %c0_39, %c24] : memref<8x16x36xbf16, #tpu.memory_space<vmem>>, vector<8x16x4xbf16>
    tpu.vector_store %arg7[%c0_38, %c0_39, %c24], %33 {strides = array<i32>} : memref<8x16x36xbf16, #tpu.memory_space<vmem>>, vector<8x16x4xbf16>,
    %c2_i32_40 = arith.constant 2 : i32
    %35 = arith.addi %1, %c2_i32_40 : i32
    %36 = arith.index_cast %35 : i32 to index
    %c1_41 = arith.constant 1 : index
    %c0_42 = arith.constant 0 : index
    %37 = vector.load %arg6[%36, %c1_41, %c0_42] : memref<18x18x4xbf16, #tpu.memory_space<vmem>>, vector<8x16x4xbf16>
    %c0_43 = arith.constant 0 : index
    %c0_44 = arith.constant 0 : index
    %c28 = arith.constant 28 : index
    %38 = vector.load %arg7[%c0_43, %c0_44, %c28] : memref<8x16x36xbf16, #tpu.memory_space<vmem>>, vector<8x16x4xbf16>
    tpu.vector_store %arg7[%c0_43, %c0_44, %c28], %37 {strides = array<i32>} : memref<8x16x36xbf16, #tpu.memory_space<vmem>>, vector<8x16x4xbf16>,
    %c2_i32_45 = arith.constant 2 : i32
    %39 = arith.addi %1, %c2_i32_45 : i32
    %40 = arith.index_cast %39 : i32 to index
    %c2_46 = arith.constant 2 : index
    %c0_47 = arith.constant 0 : index
    %41 = vector.load %arg6[%40, %c2_46, %c0_47] : memref<18x18x4xbf16, #tpu.memory_space<vmem>>, vector<8x16x4xbf16>
    %c0_48 = arith.constant 0 : index
    %c0_49 = arith.constant 0 : index
    %c32 = arith.constant 32 : index
    %42 = vector.load %arg7[%c0_48, %c0_49, %c32] : memref<8x16x36xbf16, #tpu.memory_space<vmem>>, vector<8x16x4xbf16>
    tpu.vector_store %arg7[%c0_48, %c0_49, %c32], %41 {strides = array<i32>} : memref<8x16x36xbf16, #tpu.memory_space<vmem>>, vector<8x16x4xbf16>,
    %c0_50 = arith.constant 0 : index
    %c0_51 = arith.constant 0 : index
    %c0_52 = arith.constant 0 : index
    %43 = vector.load %arg7[%c0_50, %c0_51, %c0_52] : memref<8x16x36xbf16, #tpu.memory_space<vmem>>, vector<8x16x36xbf16>
    %44 = vector.shape_cast %43 : vector<8x16x36xbf16> to vector<128x36xbf16>
    %c0_53 = arith.constant 0 : index
    %c0_54 = arith.constant 0 : index
    %45 = vector.load %arg3[%c0_53, %c0_54] : memref<36x128xbf16, #tpu.memory_space<vmem>>, vector<36x128xbf16>
    %cst_55 = arith.constant dense<0.000000e+00> : vector<128x128xf32>
    %46 = tpu.matmul %44, %45, %cst_55 {dimension_numbers = #tpu.dot_dimension_numbers<[1], [0], [0], [1], [0, 0, 1, 1], [], []>} : vector<128x36xbf16>, vector<36x128xbf16>, vector<128x128xf32> -> vector<128x128xf32>
    %c0_56 = arith.constant 0 : index
    %c0_57 = arith.constant 0 : index
    %47 = vector.load %arg4[%c0_56, %c0_57] : memref<1x128xf32, #tpu.memory_space<vmem>>, vector<1x128xf32>
    %48 = vector.broadcast %47 : vector<1x128xf32> to vector<128x128xf32>
    %49 = arith.addf %46, %48 : vector<128x128xf32>
    %50 = vector.shape_cast %49 : vector<128x128xf32> to vector<1x8x16x128xf32>
    %c0_58 = arith.constant 0 : index
    %c0_59 = arith.constant 0 : index
    %c0_60 = arith.constant 0 : index
    %c0_61 = arith.constant 0 : index
    %51 = vector.load %arg5[%c0_58, %c0_59, %c0_60, %c0_61] : memref<1x8x16x128xf32, #tpu.memory_space<vmem>>, vector<1x8x16x128xf32>
    tpu.vector_store %arg5[%c0_58, %c0_59, %c0_60, %c0_61], %50 {strides = array<i32>} : memref<1x8x16x128xf32, #tpu.memory_space<vmem>>, vector<1x8x16x128xf32>,
    return
  }
  func.func @transform_0(%arg0: i32, %arg1: i32) -> (i32, i32, i32, i32) {
    %c0_i32 = arith.constant 0 : i32
    %c0_i32_0 = arith.constant 0 : i32
    %c0_i32_1 = arith.constant 0 : i32
    %c0_i32_2 = arith.constant 0 : i32
    return %arg0, %c0_i32, %c0_i32_0, %c0_i32_1 : i32, i32, i32, i32
  }
  func.func @transform_1(%arg0: i32, %arg1: i32) -> (i32, i32) {
    %c0_i32 = arith.constant 0 : i32
    %c0_i32_0 = arith.constant 0 : i32
    %c0_i32_1 = arith.constant 0 : i32
    return %c0_i32, %c0_i32_0 : i32, i32
  }
  func.func @transform_2(%arg0: i32, %arg1: i32) -> (i32, i32) {
    %c0_i32 = arith.constant 0 : i32
    %c0_i32_0 = arith.constant 0 : i32
    %c0_i32_1 = arith.constant 0 : i32
    return %c0_i32, %c0_i32_0 : i32, i32
  }
  func.func @transform_3(%arg0: i32, %arg1: i32) -> (i32, i32, i32, i32) {
    %c0_i32 = arith.constant 0 : i32
    %c0_i32_0 = arith.constant 0 : i32
    %c0_i32_1 = arith.constant 0 : i32
    return %arg0, %arg1, %c0_i32, %c0_i32_0 : i32, i32, i32, i32
  }
}

</mosaic_0001>

<bundles_post_ra>
// kernel: tpu_custom_call.1
= control target key start
LH: loop header
LB: loop body
LE: loop exit
PB: predicated region body
PF: predicated region fallthrough
CT: control target
= control target key end

     0   :  { %8 = vsyncpa [#allocation5], 0  ;;  %s3878_s0 = inlined_call_operand.vmem [shape: bf16[2,16,16,4], index: 0, kind: input, shape index: {}]   ;;  %s3879_s1 = inlined_call_operand.vmem [shape: bf16[36,128], index: 1, kind: input, shape index: {}]   ;;  %s3880_s2 = inlined_call_operand.vmem [shape: f32[1,128], index: 2, kind: input, shape index: {}]   ;;  %s3881_s3 = inlined_call_operand.hbm [shape: f32[2,16,16,128], index: 3, kind: output, shape index: {}]  }
   0x1   :  { %10 = vsyncpa [#allocation5 + $0x1], 0  ;;  %s3002_s12 = smov 0   ;;  %s3004_s13 = smov 0  }
   0x2   :  { %s3006_s14 = smov 0   ;;  %s3008_s15 = smov 0  }
   0x3   :  { %s3010_s16 = smov 0   ;;  %s3012_s17 = smov 0  }
   0x4   :  { %s3014_s18 = smov 0   ;;  %s3016_s19 = smov 0  }
   0x5 LB: > { %s2345_s20 = sadd.s32 4294967295, %s2969_s19   ;;  %s2346_s21 = sadd.s32 4294967294, %s2969_s19   ;;  %s2969_s19 = sphi %s3016_s19, %s16_s19   ;;  %s2965_s18 = sphi %s3014_s18, %s3906_s18   ;;  %s2961_s17 = sphi %s3012_s17, %s3905_s17   ;;  %s2957_s16 = sphi %s3010_s16, %s3904_s16   ;;  %s2953_s15 = sphi %s3008_s15, %s3903_s15   ;;  %s2949_s14 = sphi %s3006_s14, %s3902_s14   ;;  %s2945_s13 = sphi %s3004_s13, %s3901_s13   ;;  %s2941_s12 = sphi %s3002_s12, %s3900_s12  }
   0x6   : > { %s25_s22 = sadd.s32 1, %s2961_s17  ;;  %s28_s23 = sadd.s32 1, %s2965_s18 }
   0x7   : > { %p26_p0 = scmp.ge.s32.totalorder %s25_s22, 2  ;;  %p115_p1 = scmp.ne.s32.totalorder %s2949_s14, %s2945_s13 }
   0x8   : > { %p116_p2 = scmp.eq.s32.totalorder %s2345_s20, 3  ;;  %p121_p5 = scmp.ne.s32.totalorder %s2945_s13, %s2941_s12 }
   0x9   : > { %s3908_s22 = smov (%p26_p0, %s25_s22), 0  ;;  %s3910_s23 = smov (!%p26_p0, %s28_s23), %s2965_s18 }
   0xa   : > { %s101_s24 = ssub.s32 %s2961_s17, %s3908_s22  ;;  %p3053_p3 = por %p116_p2, %p115_p1 }
   0xb   : > { %p30_p4 = scmp.ge.s32.totalorder %s3910_s23, 2  ;;  %p122_p6 = scmp.eq.s32.totalorder %s2346_s21, 3 }
   0xc   : > { %p2349_p7 = scmp.ge.s32.totalorder %s2969_s19, 1  ;;  %p154_p9 = scmp.lt.s32.totalorder %s2969_s19, 5 }
   0xd   : > { %s3912_s23 = smov (%p30_p4, %s3910_s23), 0  ;;  %p3062_p8 = por %p122_p6, %p121_p5 }
   0xe   : > { %s100_s27 = ssub.s32 %s2965_s18, %s3912_s23  ;;  %s105_s28 = sadd.s32 1, %s2949_s14 }
   0xf   : > { %s102_s29 = sor.u32 %s101_s24, %s100_s27  ;;  %p155_p10 = pnand %p2349_p7, %p154_p9 }
  0x10   : > { %p103_p11 = scmp.eq.s32.totalorder %s102_s29, 0  ;;  %p178_p12 = scmp.lt.s32.totalorder (!%p155_p10), %s2957_s16, 1  ;;  %vm186_vm0 = vcmask (!%p155_p10), 27648   ;;  %vm189_vm1 = vcmask (!%p155_p10), 24576   ;;  %v2971_v0 = vmov (!%p155_p10), 0   ;;  %vm1097_vm8 = vcmask (!%p155_p10), 1046528  }
  0x11   : > { %158 = sbr.rel (%p155_p10) target bundleno = 590 (0x24e), region = 32  ;;  %187 = vst.msk [vmem:[#allocation2] sm:$0xf] (!%p155_p10), %vm186_vm0, %v2971_v0  ;;  %188 = vst.msk [vmem:[#allocation2 + $0x4] sm:$0xf] (!%p155_p10), %vm186_vm0, %v2971_v0  ;;  %s2972_s11 = smov (!%p155_p10), 12  }
  0x12   : > { %s3071_s30 = scalar_select %p103_p11, %s2949_s14, %s105_s28  }
  0x13   : > { %190 = vst.msk [vmem:[#allocation2 + $0x8] sm:$0x1] (!%p155_p10), %vm189_vm1, %v2971_v0  ;;  %193 = vst.msk [vmem:[#allocation2 + $0x14] sm:$0x1] (!%p155_p10), %vm189_vm1, %v2971_v0  ;;  %vm274_vm2 = vsmask.f32 (!%p155_p10), 256 }
  0x14   : > { %191 = vst.msk [vmem:[#allocation2 + $0xc] sm:$0xf] (!%p155_p10), %vm186_vm0, %v2971_v0  ;;  %192 = vst.msk [vmem:[#allocation2 + $0x10] sm:$0xf] (!%p155_p10), %vm186_vm0, %v2971_v0  ;;  %vm275_vm3 = vsmask.f32 (!%p155_p10), 4368 }
  0x15   : > { %194 = vst.msk [vmem:[#allocation2 + $0x18] sm:$0xf] (!%p155_p10), %vm186_vm0, %v2971_v0  ;;  %195 = vst.msk [vmem:[#allocation2 + $0x1c] sm:$0xf] (!%p155_p10), %vm186_vm0, %v2971_v0  ;;  %vm599_vm5 = vsmask.f32 (!%p155_p10), 7938 }
  0x16   : > { %196 = vst.msk [vmem:[#allocation2 + $0x20] sm:$0x1] (!%p155_p10), %vm189_vm1, %v2971_v0  ;;  %199 = vst.msk [vmem:[#allocation2 + $0x2c] sm:$0x1] (!%p155_p10), %vm189_vm1, %v2971_v0  ;;  %s2628_s9 = smul.u32 (!%p155_p10), 96, %s2953_s15  ;;  %s2973_s20 = smov (!%p155_p10), 8  }
  0x17   : > { %197 = vst.msk [vmem:[#allocation2 + $0x24] sm:$0xf] (!%p155_p10), %vm186_vm0, %v2971_v0  ;;  %198 = vst.msk [vmem:[#allocation2 + $0x28] sm:$0xf] (!%p155_p10), %vm186_vm0, %v2971_v0  ;;  %vm879_vm9 = vsmask.f32 (!%p155_p10), 7424 }
  0x18   : > { %200 = vst.msk [vmem:[#allocation2 + $0x30] sm:$0xf] %vm186_vm0, %v2971_v0  ;;  %201 = vst.msk [vmem:[#allocation2 + $0x34] sm:$0xf] %vm186_vm0, %v2971_v0  ;;  %s179_s4 = scalar_select %p178_p12, %s2957_s16, 1  ;;  %vm782_vm10 = vcmask 31744  }
  0x19   : > { %202 = vst.msk [vmem:[#allocation2 + $0x38] sm:$0x1] %vm189_vm1, %v2971_v0  ;;  %205 = vst.msk [vmem:[#allocation2 + $0x44] sm:$0x1] %vm189_vm1, %v2971_v0  ;;  %s3451_s10 = scalar_lea.vmem [#allocation2], %s2628_s9  ;;  %s2974_s21 = smov 4  }
  0x1a   : > { %203 = vst.msk [vmem:[#allocation2 + $0x3c] sm:$0xf] %vm186_vm0, %v2971_v0  ;;  %204 = vst.msk [vmem:[#allocation2 + $0x40] sm:$0xf] %vm186_vm0, %v2971_v0  ;;  %s2627_s5 = sshll.u32 %s179_s4, 7  ;;  %s2975_s24 = smov 16  }
  0x1b   : > { %206 = vst.msk [vmem:[#allocation2 + $0x48] sm:$0xf] %vm186_vm0, %v2971_v0  ;;  %207 = vst.msk [vmem:[#allocation2 + $0x4c] sm:$0xf] %vm186_vm0, %v2971_v0  ;;  %s3134_s8 = scalar_lea.vmem %s3878_s0, %s2627_s5  ;;  %s2976_s27 = smov 20   ;;  %vm1000_vm11 = vcmask 64544  }
  0x1c   : > { %208 = vst.msk [vmem:[#allocation2 + $0x50] sm:$0x1] %vm189_vm1, %v2971_v0  ;;  %211 = vst.msk [vmem:[#allocation2 + $0x5c] sm:$0x1] %vm189_vm1, %v2971_v0  ;;  %v242_v1 = vld [vmem:[%s3134_s8] sm:$0xf] }
  0x1d   : > { %209 = vst.msk [vmem:[#allocation2 + $0x54] sm:$0xf] %vm186_vm0, %v2971_v0  ;;  %210 = vst.msk [vmem:[#allocation2 + $0x58] sm:$0xf] %vm186_vm0, %v2971_v0  ;;  %v243_v2 = vld [vmem:[%s3134_s8 + $0x4] sm:$0xf] }
  0x1e   : > { %212 = vst.msk [vmem:[#allocation2 + $0x60] sm:$0xf] %vm186_vm0, %v2971_v0  ;;  %213 = vst.msk [vmem:[#allocation2 + $0x64] sm:$0xf] %vm186_vm0, %v2971_v0  ;;  %v244_v3 = vld [vmem:[%s3134_s8 + $0x8] sm:$0xf] }
  0x1f   : > { %214 = vst.msk [vmem:[#allocation2 + $0x68] sm:$0x1] %vm189_vm1, %v2971_v0  ;;  %217 = vst.msk [vmem:[#allocation2 + $0x74] sm:$0x1] %vm189_vm1, %v2971_v0  ;;  %v245_v4 = vld [vmem:[%s3134_s8 + $0xc] sm:$0xf] }
  0x20   : > { %215 = vst.msk [vmem:[#allocation2 + $0x6c] sm:$0xf] %vm186_vm0, %v2971_v0  ;;  %216 = vst.msk [vmem:[#allocation2 + $0x70] sm:$0xf] %vm186_vm0, %v2971_v0  ;;  %v246_v5 = vld [vmem:[%s3134_s8 + $0x10] sm:$0xf] }
  0x21   : > { %218 = vst.msk [vmem:[#allocation2 + $0x78] sm:$0xf] %vm186_vm0, %v2971_v0  ;;  %219 = vst.msk [vmem:[#allocation2 + $0x7c] sm:$0xf] %vm186_vm0, %v2971_v0  ;;  %v247_v6 = vld [vmem:[%s3134_s8 + $0x14] sm:$0xf] }
  0x22   : > { %220 = vst.msk [vmem:[#allocation2 + $0x80] sm:$0x1] %vm189_vm1, %v2971_v0  ;;  %223 = vst.msk [vmem:[#allocation2 + $0x8c] sm:$0x1] %vm189_vm1, %v2971_v0  ;;  %v278_v7 = vshrl.u32 %v242_v1, 16  ;;  %v281_v8 = vshll.u32 %v242_v1, 16 }
  0x23   : > { %221 = vst.msk [vmem:[#allocation2 + $0x84] sm:$0xf] %vm186_vm0, %v2971_v0  ;;  %222 = vst.msk [vmem:[#allocation2 + $0x88] sm:$0xf] %vm186_vm0, %v2971_v0  ;;  %v286_v9 = vshrl.u32 %v243_v2, 16  ;;  %v289_v10 = vshll.u32 %v243_v2, 16 }
  0x24   : > { %224 = vst.msk [vmem:[#allocation2 + $0x90] sm:$0xf] %vm186_vm0, %v2971_v0  ;;  %225 = vst.msk [vmem:[#allocation2 + $0x94] sm:$0xf] %vm186_vm0, %v2971_v0  ;;  %v295_v11 = vshrl.u32 %v244_v3, 16  ;;  %v298_v12 = vshll.u32 %v244_v3, 16 }
  0x25   : > { %226 = vst.msk [vmem:[#allocation2 + $0x98] sm:$0x1] %vm189_vm1, %v2971_v0  ;;  %229 = vst.msk [vmem:[#allocation2 + $0xa4] sm:$0x1] %vm189_vm1, %v2971_v0  ;;  %v280_v13 = vrot.slane %v278_v7, 7  ;;  %v303_v14 = vshrl.u32 %v245_v4, 16 }
  0x26   : > { %227 = vst.msk [vmem:[#allocation2 + $0x9c] sm:$0xf] %vm186_vm0, %v2971_v0  ;;  %228 = vst.msk [vmem:[#allocation2 + $0xa0] sm:$0xf] %vm186_vm0, %v2971_v0  ;;  %v306_v15 = vshll.u32 %v245_v4, 16  ;;  %v312_v16 = vshrl.u32 %v246_v5, 16 }
  0x27   : > { %230 = vst.msk [vmem:[#allocation2 + $0xa8] sm:$0xf] %vm186_vm0, %v2971_v0  ;;  %231 = vst.msk [vmem:[#allocation2 + $0xac] sm:$0xf] %vm186_vm0, %v2971_v0  ;;  %v3142_v17 = vrot.slane %v286_v9, 7  ;;  %v297_v18 = vrot.slane %v295_v11, 7  ;;  %v3151_v23 = vor.u32 %v281_v8, %v280_v13 }
  0x28   : > { %232 = vst.msk [vmem:[#allocation2 + $0xb0] sm:$0x1] %vm189_vm1, %v2971_v0  ;;  %235 = vst.msk [vmem:[#allocation2 + $0xbc] sm:$0x1] %vm189_vm1, %v2971_v0  ;;  %v315_v19 = vshll.u32 %v246_v5, 16  ;;  %v320_v20 = vshrl.u32 %v247_v6, 16 }
  0x29   : > { %233 = vst.msk [vmem:[#allocation2 + $0xb4] sm:$0xf] %vm186_vm0, %v2971_v0  ;;  %234 = vst.msk [vmem:[#allocation2 + $0xb8] sm:$0xf] %vm186_vm0, %v2971_v0  ;;  %v248_v21 = vld [vmem:[%s3134_s8 + $0x18] sm:$0xf]  ;;  %v291_v28 = vor.u32 %v289_v10, %v3142_v17  ;;  %v3158_v30 = vor.u32 %v298_v12, %v297_v18 }
  0x2a   : > { %236 = vst.msk [vmem:[#allocation2 + $0xc0] sm:$0xf] %vm186_vm0, %v2971_v0  ;;  %237 = vst.msk [vmem:[#allocation2 + $0xc4] sm:$0xf] %vm186_vm0, %v2971_v0  ;;  %v284_v24 = vrot.slane %v280_v13, 4  ;;  %v3153_v25 = vrot.slane %v303_v14, 7 }
  0x2b   : > { %238 = vst.msk [vmem:[#allocation2 + $0xc8] sm:$0x1] %vm189_vm1, %v2971_v0  ;;  %241 = vst.msk [vmem:[#allocation2 + $0xd4] sm:$0x1] %vm189_vm1, %v2971_v0  ;;  %v314_v26 = vrot.slane %v312_v16, 7  ;;  %v293_v29 = vrot.slane %v3142_v17, 4 }
  0x2c   : > { %239 = vst.msk [vmem:[#allocation2 + $0xcc] sm:$0xf] %vm186_vm0, %v2971_v0  ;;  %240 = vst.msk [vmem:[#allocation2 + $0xd0] sm:$0xf] %vm186_vm0, %v2971_v0  ;;  %v249_v27 = vld [vmem:[%s3134_s8 + $0x1c] sm:$0xf]  ;;  %v308_v33 = vor.u32 %v306_v15, %v3153_v25 }
  0x2d   : > { %vm3147_vm4 = vmor %vm274_vm2, %vm275_vm3  ;;  %v301_v31 = vrot.slane %v297_v18, 4  ;;  %v250_v32 = vld [vmem:[%s3134_s8 + $0x20] sm:$0xf]  ;;  %v310_v34 = vrot.slane %v3153_v25, 4  ;;  %v3163_v35 = vor.u32 %v315_v19, %v314_v26  ;;  %v318_v36 = vrot.slane %v314_v26, 4  ;;  %s2977_s28 = smov 24  }
  0x2e   : > { %v251_v37 = vld [vmem:[%s3134_s8 + $0x24] sm:$0xf]  ;;  %v292_v38 = vsel %vm3147_vm4, %v284_v24, %v291_v28  ;;  %v3168_v39 = vrot.slane %v320_v20, 7  ;;  %v323_v40 = vshll.u32 %v247_v6, 16  ;;  %v329_v41 = vshrl.u32 %v248_v21, 16  ;;  %vm3302_vm6 = vmand %vm186_vm0, %vm599_vm5  ;;  %s2978_s29 = smov 28  }
  0x2f   : > { %v309_v42 = vsel %vm3147_vm4, %v301_v31, %v308_v33  ;;  %v332_v43 = vshll.u32 %v248_v21, 16  ;;  %v337_v44 = vshrl.u32 %v249_v27, 16  ;;  %v340_v45 = vshll.u32 %v249_v27, 16  ;;  %604 = vst.msk [vmem:[#allocation2 + $0x10] sm:$0xf] %vm186_vm0, %v292_v38  ;;  %vm3313_vm7 = vmand %vm189_vm1, %vm274_vm2  ;;  %s2979_s4 = smov 32  }
  0x30   : > { %v252_v46 = vld [vmem:[%s3134_s8 + $0x28] sm:$0xf]  ;;  %v325_v47 = vor.u32 %v323_v40, %v3168_v39  ;;  %v327_v48 = vrot.slane %v3168_v39, 4  ;;  %v331_v49 = vrot.slane %v329_v41, 7  ;;  %v346_v50 = vshrl.u32 %v250_v32, 16 }
  0x31   : > { %613 = vst.msk [vmem:[#allocation2 + $0x1c] sm:$0xf] %vm186_vm0, %v309_v42  ;;  %v253_v51 = vld [vmem:[%s3134_s8 + $0x2c] sm:$0xf]  ;;  %v3178_v52 = vrot.slane %v337_v44, 7  ;;  %v349_v53 = vshll.u32 %v250_v32, 16 }
  0x32   : > { %v354_v54 = vshrl.u32 %v251_v37, 16  ;;  %v357_v55 = vshll.u32 %v251_v37, 16  ;;  %v326_v56 = vsel %vm3147_vm4, %v318_v36, %v325_v47  ;;  %v3182_v57 = vor.u32 %v332_v43, %v331_v49  ;;  %v254_v60 = vld [vmem:[%s3134_s8 + $0x30] sm:$0xf]  ;;  %v255_v1 = vld [vmem:[%s3134_s8 + $0x34] sm:$0xf] }
  0x33   : > { %v335_v58 = vrot.slane %v331_v49, 4  ;;  %v348_v59 = vrot.slane %v346_v50, 7  ;;  %v342_v61 = vor.u32 %v340_v45, %v3178_v52  ;;  %v344_v62 = vrot.slane %v3178_v52, 4  ;;  %620 = vst.msk [vmem:[#allocation2 + $0x28] sm:$0xf] %vm186_vm0, %v326_v56 }
  0x34   : > { %v3187_v63 = vrot.slane %v354_v54, 7  ;;  %v363_v0 = vshrl.u32 %v252_v46, 16  ;;  %v366_v4 = vshll.u32 %v252_v46, 16  ;;  %v371_v5 = vshrl.u32 %v253_v51, 16  ;;  %v256_v6 = vld [vmem:[%s3134_s8 + $0x38] sm:$0xf] }
  0x35   : > { %v3191_v2 = vor.u32 %v349_v53, %v348_v59  ;;  %v352_v3 = vrot.slane %v348_v59, 4  ;;  %v343_v7 = vsel %vm3147_vm4, %v335_v58, %v342_v61  ;;  %v257_v11 = vld [vmem:[%s3134_s8 + $0x3c] sm:$0xf]  ;;  %v374_v13 = vshll.u32 %v253_v51, 16  ;;  %v258_v21 = vld [vmem:[%s3134_s8 + $0x40] sm:$0xf] }
  0x36   : > { %v359_v8 = vor.u32 %v357_v55, %v3187_v63  ;;  %v365_v10 = vrot.slane %v363_v0, 7  ;;  %v3199_v12 = vrot.slane %v371_v5, 7  ;;  %v380_v14 = vshrl.u32 %v254_v60, 16  ;;  %627 = vst.msk [vmem:[#allocation2 + $0x34] sm:$0xf] %vm186_vm0, %v343_v7 }
  0x37   : > { %v383_v15 = vshll.u32 %v254_v60, 16  ;;  %v388_v20 = vshrl.u32 %v255_v1, 16  ;;  %v391_v28 = vshll.u32 %v255_v1, 16  ;;  %v259_v31 = vld [vmem:[%s3134_s8 + $0x44] sm:$0xf]  ;;  %v397_v33 = vshrl.u32 %v256_v6, 16 }
  0x38   : > { %v360_v16 = vsel %vm3147_vm4, %v352_v3, %v359_v8  ;;  %v3204_v18 = vor.u32 %v366_v4, %v365_v10  ;;  %v369_v19 = vrot.slane %v365_v10, 4  ;;  %v376_v24 = vor.u32 %v374_v13, %v3199_v12  ;;  %v260_v43 = vld [vmem:[%s3134_s8 + $0x48] sm:$0xf]  ;;  %v261_v49 = vld [vmem:[%s3134_s8 + $0x4c] sm:$0xf] }
  0x39   : > { %v382_v27 = vrot.slane %v380_v14, 7  ;;  %634 = vst.msk [vmem:[#allocation2 + $0x40] sm:$0xf] %vm186_vm0, %v360_v16  ;;  %v3211_v32 = vrot.slane %v388_v20, 7  ;;  %v400_v36 = vshll.u32 %v256_v6, 16  ;;  %v405_v37 = vshrl.u32 %v257_v11, 16 }
  0x3a   : > { %v377_v38 = vsel %vm3147_vm4, %v369_v19, %v376_v24  ;;  %v408_v42 = vshll.u32 %v257_v11, 16  ;;  %v399_v46 = vrot.slane %v397_v33, 7  ;;  %v414_v50 = vshrl.u32 %v258_v21, 16  ;;  %v262_v55 = vld [vmem:[%s3134_s8 + $0x50] sm:$0xf] }
  0x3b   : > { %v3215_v40 = vor.u32 %v383_v15, %v382_v27  ;;  %v386_v41 = vrot.slane %v382_v27, 4  ;;  %v393_v44 = vor.u32 %v391_v28, %v3211_v32  ;;  %v3220_v47 = vrot.slane %v405_v37, 7  ;;  %641 = vst.msk [vmem:[#allocation2 + $0x4c] sm:$0xf] %vm186_vm0, %v377_v38  ;;  %v263_v61 = vld [vmem:[%s3134_s8 + $0x54] sm:$0xf] }
  0x3c   : > { %v417_v51 = vshll.u32 %v258_v21, 16  ;;  %v422_v53 = vshrl.u32 %v259_v31, 16  ;;  %v425_v54 = vshll.u32 %v259_v31, 16  ;;  %v3227_v58 = vor.u32 %v400_v36, %v399_v46  ;;  %v264_v5 = vld [vmem:[%s3134_s8 + $0x58] sm:$0xf] }
  0x3d   : > { %v394_v56 = vsel %vm3147_vm4, %v386_v41, %v393_v44  ;;  %v403_v59 = vrot.slane %v399_v46, 4  ;;  %v410_v60 = vor.u32 %v408_v42, %v3220_v47  ;;  %v416_v1 = vrot.slane %v414_v50, 7  ;;  %v265_v16 = vld [vmem:[%s3134_s8 + $0x5c] sm:$0xf]  ;;  %v266_v27 = vld [vmem:[%s3134_s8 + $0x60] sm:$0xf] }
  0x3e   : > { %v3232_v3 = vrot.slane %v422_v53, 7  ;;  %v431_v4 = vshrl.u32 %v260_v43, 16  ;;  %648 = vst.msk [vmem:[#allocation2 + $0x58] sm:$0xf] %vm186_vm0, %v394_v56  ;;  %v434_v7 = vshll.u32 %v260_v43, 16  ;;  %v439_v8 = vshrl.u32 %v261_v49, 16 }
  0x3f   : > { %v411_v6 = vsel %vm3147_vm4, %v403_v59, %v410_v60  ;;  %v442_v10 = vshll.u32 %v261_v49, 16  ;;  %v3238_v11 = vor.u32 %v417_v51, %v416_v1  ;;  %v420_v13 = vrot.slane %v416_v1, 4  ;;  %v267_v50 = vld [vmem:[%s3134_s8 + $0x64] sm:$0xf]  ;;  %v268_v56 = vld [vmem:[%s3134_s8 + $0x68] sm:$0xf] }
  0x40   : > { %v427_v14 = vor.u32 %v425_v54, %v3232_v3  ;;  %655 = vst.msk [vmem:[#allocation2 + $0x64] sm:$0xf] %vm186_vm0, %v411_v6  ;;  %v433_v19 = vrot.slane %v431_v4, 7  ;;  %v3244_v20 = vrot.slane %v439_v8, 7  ;;  %v448_v21 = vshrl.u32 %v262_v55, 16 }
  0x41   : > { %v451_v24 = vshll.u32 %v262_v55, 16  ;;  %v456_v31 = vshrl.u32 %v263_v61, 16  ;;  %v459_v33 = vshll.u32 %v263_v61, 16  ;;  %v465_v36 = vshrl.u32 %v264_v5, 16  ;;  %v269_v4 = vld [vmem:[%s3134_s8 + $0x6c] sm:$0xf] }
  0x42   : > { %v428_v28 = vsel %vm3147_vm4, %v420_v13, %v427_v14  ;;  %v3249_v37 = vor.u32 %v434_v7, %v433_v19  ;;  %v437_v38 = vrot.slane %v433_v19, 4  ;;  %v444_v41 = vor.u32 %v442_v10, %v3244_v20  ;;  %v270_v10 = vld [vmem:[%s3134_s8 + $0x70] sm:$0xf]  ;;  %v631_v1 = vld [vmem:[#allocation2 + $0x3c] sm:$0xf] }
  0x43   : > { %662 = vst.msk [vmem:[#allocation2 + $0x70] sm:$0xf] %vm186_vm0, %v428_v28  ;;  %v450_v43 = vrot.slane %v448_v21, 7  ;;  %v3254_v44 = vrot.slane %v456_v31, 7  ;;  %v467_v46 = vrot.slane %v465_v36, 7  ;;  %v468_v49 = vshll.u32 %v264_v5, 16 }
  0x44   : > { %v445_v51 = vsel %vm3147_vm4, %v437_v38, %v444_v41  ;;  %v473_v53 = vshrl.u32 %v265_v16, 16  ;;  %v476_v54 = vshll.u32 %v265_v16, 16  ;;  %v482_v55 = vshrl.u32 %v266_v27, 16  ;;  %v271_v21 = vld [vmem:[%s3134_s8 + $0x74] sm:$0xf] }
  0x45   : > { %v3260_v59 = vor.u32 %v451_v24, %v450_v43  ;;  %v454_v60 = vrot.slane %v450_v43, 4  ;;  %v461_v61 = vor.u32 %v459_v33, %v3254_v44  ;;  %669 = vst.msk [vmem:[#allocation2 + $0x7c] sm:$0xf] %vm186_vm0, %v445_v51  ;;  %v3266_v5 = vor.u32 %v468_v49, %v467_v46  ;;  %v3278_v36 = vld [vmem:[%s3134_s8 + $0x78] sm:$0xf] }
  0x46   : > { %v471_v6 = vrot.slane %v467_v46, 4  ;;  %v3268_v7 = vrot.slane %v473_v53, 7  ;;  %v484_v8 = vrot.slane %v482_v55, 7  ;;  %v485_v14 = vshll.u32 %v266_v27, 16  ;;  %v3285_v27 = vld [vmem:[%s3134_s8 + $0x7c] sm:$0xf] }
  0x47   : > { %v462_v13 = vsel %vm3147_vm4, %v454_v60, %v461_v61  ;;  %v490_v16 = vshrl.u32 %v267_v50, 16  ;;  %v493_v19 = vshll.u32 %v267_v50, 16  ;;  %v499_v33 = vshrl.u32 %v268_v56, 16  ;;  %v607_v28 = vld [vmem:[#allocation2 + $0x14] sm:$0x1] }
  0x48   : > { %v478_v24 = vor.u32 %v476_v54, %v3268_v7  ;;  %v488_v31 = vrot.slane %v484_v8, 4  ;;  %676 = vst.msk [vmem:[#allocation2 + $0x88] sm:$0xf] %vm186_vm0, %v462_v13  ;;  %v3280_v38 = vor.u32 %v485_v14, %v484_v8  ;;  %v502_v43 = vshll.u32 %v268_v56, 16  ;;  %v601_v8 = vld [vmem:[#allocation2 + $0xc] sm:$0xf] }
  0x49   : > { %v3282_v41 = vrot.slane %v490_v16, 7  ;;  %v507_v46 = vshrl.u32 %v269_v4, 16  ;;  %v501_v50 = vrot.slane %v499_v33, 7  ;;  %v510_v51 = vshll.u32 %v269_v4, 16  ;;  %v628_v55 = vld [vmem:[#allocation2 + $0x38] sm:$0x1] }
  0x4a   : > { %v479_v49 = vsel %vm3147_vm4, %v471_v6, %v478_v24  ;;  %v516_v53 = vshrl.u32 %v270_v10, 16  ;;  %v519_v61 = vshll.u32 %v270_v10, 16  ;;  %v524_v16 = vshrl.u32 %v271_v21, 16  ;;  %v610_v6 = vld [vmem:[#allocation2 + $0x18] sm:$0xf] }
  0x4b   : > { %v495_v54 = vor.u32 %v493_v19, %v3282_v41  ;;  %v3291_v60 = vrot.slane %v507_v46, 7  ;;  %683 = vst.msk [vmem:[#allocation2 + $0x94] sm:$0xf] %vm186_vm0, %v479_v49  ;;  %v3294_v56 = vor.u32 %v502_v43, %v501_v50  ;;  %v505_v13 = vrot.slane %v501_v50, 4  ;;  %v614_v43 = vld [vmem:[#allocation2 + $0x20] sm:$0x1] }
  0x4c   : > { %v518_v14 = vrot.slane %v516_v53, 7  ;;  %v527_v33 = vshll.u32 %v271_v21, 16  ;;  %v617_v46 = vld [vmem:[#allocation2 + $0x24] sm:$0xf]  ;;  %v3308_v53 = vrot.slane %v524_v16, 7  ;;  %v544_v16 = vshll.u32 %v3285_v27, 16 }
  0x4d   : > { %v496_v4 = vsel %vm3147_vm4, %v488_v31, %v495_v54  ;;  %v512_v19 = vor.u32 %v510_v51, %v3291_v60  ;;  %v533_v31 = vshrl.u32 %v3278_v36, 16  ;;  %v621_v21 = vld [vmem:[#allocation2 + $0x2c] sm:$0x1]  ;;  %v624_v54 = vld [vmem:[#allocation2 + $0x30] sm:$0xf]  ;;  %v632_v39 = vsel %vm3302_vm6, %v3191_v2, %v631_v1 }
  0x4e   : > { %v3306_v49 = vor.u32 %v519_v61, %v518_v14  ;;  %v522_v50 = vrot.slane %v518_v14, 4  ;;  %690 = vst.msk [vmem:[#allocation2 + $0xa0] sm:$0xf] %vm186_vm0, %v496_v4  ;;  %v536_v61 = vshll.u32 %v3278_v36, 16  ;;  %v541_v14 = vshrl.u32 %v3285_v27, 16 }
  0x4f   : > { %v513_v24 = vsel %vm3147_vm4, %v505_v13, %v512_v19  ;;  %v635_v42 = vld [vmem:[#allocation2 + $0x44] sm:$0x1]  ;;  %v638_v15 = vld [vmem:[#allocation2 + $0x48] sm:$0xf]  ;;  %v529_v0 = vor.u32 %v527_v33, %v3308_v53  ;;  %v531_v45 = vrot.slane %v3308_v53, 4  ;;  %v535_v26 = vrot.slane %v533_v31, 7 }
  0x50   : > { %v602_v4 = vsel %vm3302_vm6, %v3151_v23, %v601_v8  ;;  %v642_v13 = vld [vmem:[#allocation2 + $0x50] sm:$0x1]  ;;  %v645_v19 = vld [vmem:[#allocation2 + $0x54] sm:$0xf]  ;;  %v649_v36 = vld [vmem:[#allocation2 + $0x5c] sm:$0x1]  ;;  %v608_v27 = vsel %vm3313_vm7, %v293_v29, %v607_v28  ;;  %v611_v33 = vsel %vm3302_vm6, %v3158_v30, %v610_v6  ;;  %v615_v23 = vsel %vm3313_vm7, %v310_v34, %v614_v43 }
  0x51   : > { %697 = vst.msk [vmem:[#allocation2 + $0xac] sm:$0xf] %vm186_vm0, %v513_v24  ;;  %v3329_v9 = vrot.slane %v541_v14, 7  ;;  %603 = vst [vmem:[#allocation2 + $0xc] sm:$0xf] %v602_v4  ;;  %v530_v14 = vsel %vm3147_vm4, %v522_v50, %v529_v0  ;;  %v3344_v4 = vor.u32 %v536_v61, %v535_v26  ;;  %v539_v17 = vrot.slane %v535_v26, 4 }
  0x52   : > { %v652_v8 = vld [vmem:[#allocation2 + $0x60] sm:$0xf]  ;;  %v656_v31 = vld [vmem:[#allocation2 + $0x68] sm:$0x1]  ;;  %v659_v24 = vld [vmem:[#allocation2 + $0x6c] sm:$0xf]  ;;  %v618_v29 = vsel %vm3302_vm6, %v3163_v35, %v617_v46  ;;  %v622_v0 = vsel %vm3313_vm7, %v327_v48, %v621_v21  ;;  %v625_v26 = vsel %vm3302_vm6, %v3182_v57, %v624_v54  ;;  %v629_v35 = vsel %vm3313_vm7, %v344_v62, %v628_v55 }
  0x53   : > { %609 = vst [vmem:[#allocation2 + $0x14] sm:$0x1] %v608_v27  ;;  %612 = vst [vmem:[#allocation2 + $0x18] sm:$0xf] %v611_v33  ;;  %v663_v25 = vld [vmem:[#allocation2 + $0x74] sm:$0x1]  ;;  %v546_v34 = vor.u32 %v544_v16, %v3329_v9  ;;  %v639_v46 = vsel %vm3302_vm6, %v3204_v18, %v638_v15  ;;  %v646_v2 = vsel %vm3302_vm6, %v3215_v40, %v645_v19 }
  0x54   : > { %616 = vst [vmem:[#allocation2 + $0x20] sm:$0x1] %v615_v23  ;;  %v666_v30 = vld [vmem:[#allocation2 + $0x78] sm:$0xf]  ;;  %v548_v28 = vrot.slane %v3329_v9, 4  ;;  %v3890_v48 = vrot.slane %v3187_v63, 4 }
  0x55   : > { %619 = vst [vmem:[#allocation2 + $0x24] sm:$0xf] %v618_v29  ;;  %v670_v6 = vld [vmem:[#allocation2 + $0x80] sm:$0x1]  ;;  %v673_v43 = vld [vmem:[#allocation2 + $0x84] sm:$0xf]  ;;  %v547_v52 = vsel %vm3147_vm4, %v539_v17, %v546_v34 }
  0x56   : > { %704 = vst.msk [vmem:[#allocation2 + $0xb8] sm:$0xf] %vm186_vm0, %v530_v14  ;;  %623 = vst [vmem:[#allocation2 + $0x2c] sm:$0x1] %v622_v0  ;;  %v636_v57 = vsel %vm3313_vm7, %v3890_v48, %v635_v42  ;;  %v677_v50 = vld [vmem:[#allocation2 + $0x8c] sm:$0x1] }
  0x57   : > { %626 = vst [vmem:[#allocation2 + $0x30] sm:$0xf] %v625_v26  ;;  %v680_v21 = vld [vmem:[#allocation2 + $0x90] sm:$0xf]  ;;  %v684_v54 = vld [vmem:[#allocation2 + $0x98] sm:$0x1] }
  0x58   : > { %630 = vst [vmem:[#allocation2 + $0x38] sm:$0x1] %v629_v35  ;;  %633 = vst [vmem:[#allocation2 + $0x3c] sm:$0xf] %v632_v39  ;;  %v3891_v62 = vrot.slane %v3199_v12, 4  ;;  %v3892_v18 = vrot.slane %v3211_v32, 4  ;;  %v653_v12 = vsel %vm3302_vm6, %v3227_v58, %v652_v8  ;;  %v660_v32 = vsel %vm3302_vm6, %v3238_v11, %v659_v24 }
  0x59   : > { %637 = vst [vmem:[#allocation2 + $0x44] sm:$0x1] %v636_v57  ;;  %640 = vst [vmem:[#allocation2 + $0x48] sm:$0xf] %v639_v46  ;;  %v687_v22 = vld [vmem:[#allocation2 + $0x9c] sm:$0xf]  ;;  %v674_v11 = vsel %vm3302_vm6, %v3260_v59, %v673_v43 }
  0x5a   : > { %v643_v63 = vsel %vm3313_vm7, %v3891_v62, %v642_v13  ;;  %v650_v15 = vsel %vm3313_vm7, %v3892_v18, %v649_v36  ;;  %v691_v42 = vld [vmem:[#allocation2 + $0xa4] sm:$0x1]  ;;  %v694_v1 = vld [vmem:[#allocation2 + $0xa8] sm:$0xf]  ;;  %647 = vst [vmem:[#allocation2 + $0x54] sm:$0xf] %v646_v2 }
  0x5b   : > { %644 = vst [vmem:[#allocation2 + $0x50] sm:$0x1] %v643_v63  ;;  %651 = vst [vmem:[#allocation2 + $0x5c] sm:$0x1] %v650_v15  ;;  %v3893_v55 = vrot.slane %v3220_v47, 4  ;;  %v3894_v61 = vrot.slane %v3232_v3, 4  ;;  %v667_v47 = vsel %vm3302_vm6, %v3249_v37, %v666_v30 }
  0x5c   : > { %v698_v13 = vld [vmem:[#allocation2 + $0xb0] sm:$0x1]  ;;  %v701_v19 = vld [vmem:[#allocation2 + $0xb4] sm:$0xf]  ;;  %v705_v36 = vld [vmem:[#allocation2 + $0xbc] sm:$0x1] }
  0x5d   : > { %v657_v40 = vsel %vm3313_vm7, %v3893_v55, %v656_v31  ;;  %v664_v16 = vsel %vm3313_vm7, %v3894_v61, %v663_v25  ;;  %711 = vst.msk [vmem:[#allocation2 + $0xc4] sm:$0xf] %vm186_vm0, %v547_v52  ;;  %654 = vst [vmem:[#allocation2 + $0x60] sm:$0xf] %v653_v12  ;;  %v3895_v58 = vrot.slane %v3244_v20, 4  ;;  %v3896_v27 = vrot.slane %v3254_v44, 4 }
  0x5e   : > { %658 = vst [vmem:[#allocation2 + $0x68] sm:$0x1] %v657_v40  ;;  %661 = vst [vmem:[#allocation2 + $0x6c] sm:$0xf] %v660_v32  ;;  %v708_v23 = vld [vmem:[#allocation2 + $0xc0] sm:$0xf]  ;;  %v681_v20 = vsel %vm3302_vm6, %v3266_v5, %v680_v21  ;;  %v688_v44 = vsel %vm3302_vm6, %v3280_v38, %v687_v22  ;;  %v695_v5 = vsel %vm3302_vm6, %v3294_v56, %v694_v1 }
  0x5f   : > { %665 = vst [vmem:[#allocation2 + $0x74] sm:$0x1] %v664_v16  ;;  %v671_v3 = vsel %vm3313_vm7, %v3895_v58, %v670_v6  ;;  %v678_v33 = vsel %vm3313_vm7, %v3896_v27, %v677_v50  ;;  %v712_v8 = vld [vmem:[#allocation2 + $0xc8] sm:$0x1]  ;;  %668 = vst [vmem:[#allocation2 + $0x78] sm:$0xf] %v667_v47  ;;  %v702_v38 = vsel %vm3302_vm6, %v3306_v49, %v701_v19 }
  0x60   : > { %672 = vst [vmem:[#allocation2 + $0x80] sm:$0x1] %v671_v3  ;;  %675 = vst [vmem:[#allocation2 + $0x84] sm:$0xf] %v674_v11  ;;  %v3897_v37 = vrot.slane %v3268_v7, 4  ;;  %v3898_v31 = vrot.slane %v3282_v41, 4  ;;  %v706_v41 = vsel %vm3313_vm7, %v531_v45, %v705_v36  ;;  %v713_v56 = vsel %vm3313_vm7, %v548_v28, %v712_v8 }
  0x61   : > { %679 = vst [vmem:[#allocation2 + $0x8c] sm:$0x1] %v678_v33  ;;  %682 = vst [vmem:[#allocation2 + $0x90] sm:$0xf] %v681_v20  ;;  %v3899_v7 = vrot.slane %v3291_v60, 4  ;;  %v709_v60 = vsel %vm3302_vm6, %v3344_v4, %v708_v23  ;;  %vm1146_vm12 = vcmask 97344  }
  0x62   : > { %v685_v59 = vsel %vm3313_vm7, %v3897_v37, %v684_v54  ;;  %v692_v24 = vsel %vm3313_vm7, %v3898_v31, %v691_v42  ;;  %689 = vst [vmem:[#allocation2 + $0x9c] sm:$0xf] %v688_v44  ;;  %696 = vst [vmem:[#allocation2 + $0xa8] sm:$0xf] %v695_v5  ;;  %vm1239_vm13 = vcmask 130144   ;;  %vm2125_vm14 = vcmask 1041408  }
  0x63   : > { %686 = vst [vmem:[#allocation2 + $0x98] sm:$0x1] %v685_v59  ;;  %693 = vst [vmem:[#allocation2 + $0xa4] sm:$0x1] %v692_v24  ;;  %v699_v14 = vsel %vm3313_vm7, %v3899_v7, %v698_v13  ;;  %vm1456_vm15 = vcmask 162944   ;;  %vm1601_vm0 = vcmask 195744  }
  0x64   : > { %700 = vst [vmem:[#allocation2 + $0xb0] sm:$0x1] %v699_v14  ;;  %703 = vst [vmem:[#allocation2 + $0xb4] sm:$0xf] %v702_v38  ;;  %vm1694_vm1 = vcmask 228544   ;;  %vm1911_vm2 = vcmask 261344  }
  0x65   : > { %707 = vst [vmem:[#allocation2 + $0xbc] sm:$0x1] %v706_v41  ;;  %710 = vst [vmem:[#allocation2 + $0xc0] sm:$0xf] %v709_v60  ;;  %vm2056_vm3 = vcmask 294144   ;;  %vm2100_vm4 = vcmask 293888  }
  0x66   : > { %714 = vst [vmem:[#allocation2 + $0xc8] sm:$0x1] %v713_v56 }
  0x6d   : > { %v2752_v45 = vld [vmem:[%s3451_s10 + $0x3c] sm:$0xff]   ;;  %v2753_v9 = vld [vmem:[%s3451_s10 + $0xc] sm:$0xff]   ;;  %v2757_v51 = vld [vmem:[%s3451_s10 + $0x38] ss:$0 sps:$4 sm:$0x11]  }
  0x6e   : > { %1223 = vrot.lane.b32.xlu1 %v2752_v45, %s2972_s11  ;;  %v2754_v10 = vld [vmem:[%s3451_s10 + $0x48] sm:$0xff]   ;;  %1215 = vrot.lane.b32.xlu0 %v2753_v9, %s2972_s11  ;;  %v2755_v49 = vld [vmem:[%s3451_s10 + $0x18] sm:$0xff]   ;;  %v1111_v29 = vrot.slane %v2757_v51, 1 }
  0x6f   : > { %v2756_v53 = vld [vmem:[%s3451_s10 + $0x30] sm:$0xfe]   ;;  %v2758_v25 = vld [vmem:[%s3451_s10] sm:$0xfe]  }
  0x70   : > { %v2764_v4 = vld [vmem:[%s3451_s10 + $0xc] sm:$0xff]   ;;  %v1110_v17 = vrot.slane %v2756_v53, 1  ;;  %v2759_v30 = vld [vmem:[%s3451_s10 + $0x8] ss:$0 sps:$4 sm:$0x11]   ;;  %v1098_v0 = vrot.slane %v2758_v25, 1 }
  0x71   : > { %v893_v34 = vshrl.u32 %v2764_v4, 16  ;;  %v2760_v26 = vld [vmem:[%s3451_s10 + $0x3c] sm:$0xfe]   ;;  %v895_v6 = vshll.u32 %v2764_v4, 16  ;;  %v1099_v43 = vrot.slane %v2759_v30, 1  ;;  %v2770_v13 = vld [vmem:[%s3451_s10 + $0x30] sm:$0xff]  }
  0x72   : > { %1225 = vrot.lane.b32.xlu1 %v2754_v10, %s2972_s11  ;;  %1217 = vrot.lane.b32.xlu0 %v2755_v49, %s2972_s11  ;;  %v1112_v28 = vsel %vm1097_vm8, %v1110_v17, %v1111_v29  ;;  %v2761_v35 = vld [vmem:[%s3451_s10 + $0x44] ss:$0 sps:$4 sm:$0x11]   ;;  %v1113_v39 = vrot.slane %v2760_v26, 1  ;;  %v2762_v50 = vld [vmem:[%s3451_s10 + $0xc] sm:$0xfe]  }
  0x73   : > { %v897_v48 = vrot.slane %v895_v6, 1  ;;  %v1100_v57 = vsel %vm1097_vm8, %v1098_v0, %v1099_v43  ;;  %v1114_v46 = vrot.slane %v2761_v35, 1  ;;  %v2763_v21 = vld [vmem:[%s3451_s10 + $0x14] ss:$0 sps:$4 sm:$0x11]   ;;  %v1101_v52 = vrot.slane %v2762_v50, 1 }
  0x74   : > { %v1102_v62 = vrot.slane %v2763_v21, 1  ;;  %v2765_v63 = vld [vmem:[%s3451_s10 + $0x14] ss:$0 sps:$4 sm:$0x11]   ;;  %v2766_v2 = vld [vmem:[%s3451_s10] sm:$0xff]   ;;  %v929_v33 = vshrl.u32 %v2770_v13, 16 }
  0x75   : > { %v1115_v54 = vsel %vm1097_vm8, %v1113_v39, %v1114_v46  ;;  %v898_v18 = vor.u32 %v897_v48, %v893_v34  ;;  %v900_v22 = vshll.u32 %v2765_v63, 16  ;;  %v2767_v42 = vld [vmem:[%s3451_s10 + $0x8] ss:$0 sps:$4 sm:$0x11]   ;;  %v881_v1 = vshrl.u32 %v2766_v2, 16  ;;  %v2768_v61 = vld [vmem:[%s3451_s10 + $0x3c] sm:$0xff]  }
  0x76   : > { %1130 = vrot.lane.b32.xlu1 %v1112_v28, %s2973_s20  ;;  %1122 = vrot.lane.b32.xlu0 %v1100_v57, %s2973_s20  ;;  %v1103_v15 = vsel %vm1097_vm8, %v1101_v52, %v1102_v62  ;;  %v883_v12 = vshll.u32 %v2766_v2, 16  ;;  %v888_v32 = vshll.u32 %v2767_v42, 16  ;;  %v2769_v16 = vld [vmem:[%s3451_s10 + $0x44] ss:$0 sps:$4 sm:$0x11]   ;;  %v941_v58 = vshrl.u32 %v2768_v61, 16 }
  0x77   : > { %v902_v55 = vrot.slane %v900_v22, 1  ;;  %v943_v3 = vshll.u32 %v2768_v61, 16  ;;  %v948_v11 = vshll.u32 %v2769_v16, 16  ;;  %v2771_v27 = vld [vmem:[%s3451_s10 + $0x38] ss:$0 sps:$4 sm:$0x11]  }
  0x78   : > { %v885_v40 = vrot.slane %v883_v12, 1  ;;  %v890_v47 = vrot.slane %v888_v32, 1  ;;  %v931_v8 = vshll.u32 %v2770_v13, 16  ;;  %v2772_v20 = vld [vmem:[%s3451_s10 + $0x3c] sm:$0xff]   ;;  %v936_v44 = vshll.u32 %v2771_v27, 16  ;;  %v2774_v14 = vld [vmem:[%s3451_s10 + $0xc] sm:$0xff]  }
  0x79   : > { %v903_v19 = vsel %vm879_vm9, %v898_v18, %v902_v55  ;;  %v945_v37 = vrot.slane %v943_v3, 1  ;;  %v950_v59 = vrot.slane %v948_v11, 1  ;;  %v2773_v31 = vld [vmem:[%s3451_s10 + $0x44] ss:$0 sps:$4 sm:$0x11]   ;;  %v1385_v5 = vshrl.u32 %v2772_v20, 16 }
  0x7a   : > { %1132 = vrot.lane.b32.xlu1 %v1115_v54, %s2973_s20  ;;  %1124 = vrot.lane.b32.xlu0 %v1103_v15, %s2973_s20  ;;  %v886_v36 = vor.u32 %v885_v40, %v881_v1  ;;  %v933_v24 = vrot.slane %v931_v8, 1  ;;  %v1387_v7 = vshll.u32 %v2772_v20, 16  ;;  %v938_v41 = vrot.slane %v936_v44, 1  ;;  %v2775_v9 = vld [vmem:[%s3451_s10 + $0x14] ss:$0 sps:$4 sm:$0x11]  }
  0x7b   : > { %v946_v38 = vor.u32 %v945_v37, %v941_v58  ;;  %v1392_v60 = vshll.u32 %v2773_v31, 16  ;;  %v1337_v10 = vshrl.u32 %v2774_v14, 16  ;;  %v1339_v49 = vshll.u32 %v2774_v14, 16  ;;  %v2776_v4 = vld [vmem:[%s3451_s10 + $0x48] sm:$0xff]   ;;  %v2778_v26 = vld [vmem:[%s3451_s10 + $0x18] sm:$0xff]  }
  0x7c   : > { %v891_v23 = vsel %vm879_vm9, %v886_v36, %v890_v47  ;;  %v934_v56 = vor.u32 %v933_v24, %v929_v33  ;;  %v1389_v45 = vrot.slane %v1387_v7, 1  ;;  %v1344_v30 = vshll.u32 %v2775_v9, 16  ;;  %v2777_v34 = vld [vmem:[%s3451_s10 + $0x50] ss:$0 sps:$4 sm:$0x11]   ;;  %v2792_v8 = vld [vmem:[%s3451_s10 + $0x48] sm:$0xff]  }
  0x7d   : > { %v951_v53 = vsel %vm879_vm9, %v946_v38, %v950_v59  ;;  %v1394_v51 = vrot.slane %v1392_v60, 1  ;;  %v1341_v25 = vrot.slane %v1339_v49, 1  ;;  %v1397_v28 = vshrl.u32 %v2776_v4, 16  ;;  %v2779_v57 = vld [vmem:[%s3451_s10 + $0x20] ss:$0 sps:$4 sm:$0x11]  }
  0x7e   : > { %978 = vrot.lane.b32.xlu1 %v903_v19, %s2974_s21  ;;  %976 = vrot.lane.b32.xlu0 %v891_v23, %s2974_s21  ;;  %v939_v17 = vsel %vm879_vm9, %v934_v56, %v938_v41  ;;  %v1390_v29 = vor.u32 %v1389_v45, %v1385_v5  ;;  %v1399_v0 = vshll.u32 %v2776_v4, 16  ;;  %v1346_v35 = vrot.slane %v1344_v30, 1  ;;  %v2780_v63 = vld [vmem:[%s3451_s10 + $0x3c] sm:$0xfe]   ;;  %v2782_v55 = vld [vmem:[%s3451_s10 + $0xc] sm:$0xfe]  }
  0x7f   : > { %v1342_v43 = vor.u32 %v1341_v25, %v1337_v10  ;;  %v1404_v48 = vshll.u32 %v2777_v34, 16  ;;  %v1349_v50 = vshrl.u32 %v2778_v26, 16  ;;  %v1351_v21 = vshll.u32 %v2778_v26, 16  ;;  %v2781_v18 = vld [vmem:[%s3451_s10 + $0x44] ss:$0 sps:$4 sm:$0x11]  }
  0x80   : > { %v1395_v6 = vsel %vm879_vm9, %v1390_v29, %v1394_v51  ;;  %v1401_v39 = vrot.slane %v1399_v0, 1  ;;  %v1356_v62 = vshll.u32 %v2779_v57, 16  ;;  %v1565_v42 = vrot.slane %v2780_v63, 1  ;;  %v2783_v40 = vld [vmem:[%s3451_s10 + $0x14] ss:$0 sps:$4 sm:$0x11]  }
  0x81   : > { %v1347_v46 = vsel %vm879_vm9, %v1342_v43, %v1346_v35  ;;  %v1406_v52 = vrot.slane %v1404_v48, 1  ;;  %v1353_v2 = vrot.slane %v1351_v21, 1  ;;  %v1566_v12 = vrot.slane %v2781_v18, 1  ;;  %v2784_v19 = vld [vmem:[%s3451_s10 + $0x48] sm:$0xfe]   ;;  %v2794_v59 = vld [vmem:[%s3451_s10 + $0x18] sm:$0xff]  }
  0x82   : > { %986 = vrot.lane.b32.xlu1 %v951_v53, %s2974_s21  ;;  %984 = vrot.lane.b32.xlu0 %v939_v17, %s2974_s21  ;;  %v1402_v54 = vor.u32 %v1401_v39, %v1397_v28  ;;  %v1358_v22 = vrot.slane %v1356_v62, 1  ;;  %v1553_v16 = vrot.slane %v2782_v55, 1  ;;  %v1554_v13 = vrot.slane %v2783_v40, 1  ;;  %v2785_v36 = vld [vmem:[%s3451_s10 + $0x50] ss:$0 sps:$4 sm:$0x11]  }
  0x83   : > { %v1354_v1 = vor.u32 %v1353_v2, %v1349_v50  ;;  %v1567_v61 = vsel %vm1097_vm8, %v1565_v42, %v1566_v12  ;;  %v1568_v58 = vrot.slane %v2784_v19, 1  ;;  %v2786_v3 = vld [vmem:[%s3451_s10 + $0x18] sm:$0xfe]   ;;  %v1569_v11 = vrot.slane %v2785_v36, 1  ;;  %v2788_v23 = vld [vmem:[%s3451_s10 + $0x48] sm:$0xff]  }
  0x84   : > { %v1407_v15 = vsel %vm879_vm9, %v1402_v54, %v1406_v52  ;;  %v1555_v47 = vsel %vm1097_vm8, %v1553_v16, %v1554_v13  ;;  %v2787_v27 = vld [vmem:[%s3451_s10 + $0x20] ss:$0 sps:$4 sm:$0x11]   ;;  %v1556_v33 = vrot.slane %v2786_v3, 1  ;;  %v2789_v31 = vld [vmem:[%s3451_s10 + $0x18] sm:$0xff]   ;;  %v1840_v7 = vshrl.u32 %v2792_v8, 16 }
  0x85   : > { %v1359_v32 = vsel %vm879_vm9, %v1354_v1, %v1358_v22  ;;  %v1570_v20 = vsel %vm1097_vm8, %v1568_v58, %v1569_v11  ;;  %v1557_v37 = vrot.slane %v2787_v27, 1  ;;  %v2790_v24 = vld [vmem:[%s3451_s10 + $0x54] sm:$0xff]   ;;  %v2793_v5 = vld [vmem:[%s3451_s10 + $0x50] ss:$0 sps:$4 sm:$0x11]   ;;  %v1842_v14 = vshll.u32 %v2792_v8, 16 }
  0x86   : > { %1440 = vrot.lane.b32.xlu1 %v1395_v6, %s2975_s24  ;;  %1432 = vrot.lane.b32.xlu0 %v1347_v46, %s2975_s24  ;;  %v1792_v38 = vshrl.u32 %v2794_v59, 16  ;;  %v1847_v60 = vshll.u32 %v2793_v5, 16  ;;  %v2795_v56 = vld [vmem:[%s3451_s10 + $0x20] ss:$0 sps:$4 sm:$0x11]   ;;  %v1794_v45 = vshll.u32 %v2794_v59, 16 }
  0x87   : > { %v1558_v44 = vsel %vm1097_vm8, %v1556_v33, %v1557_v37  ;;  %v1844_v41 = vrot.slane %v1842_v14, 1  ;;  %v2791_v9 = vld [vmem:[%s3451_s10 + $0x24] sm:$0xff]   ;;  %v1799_v51 = vshll.u32 %v2795_v56, 16  ;;  %v2796_v4 = vld [vmem:[%s3451_s10 + $0x54] sm:$0xff]  }
  0x88   : > { %v1849_v49 = vrot.slane %v1847_v60, 1  ;;  %v1796_v53 = vrot.slane %v1794_v45, 1  ;;  %v2797_v17 = vld [vmem:[%s3451_s10 + $0x5c] ss:$0 sps:$4 sm:$0x11]   ;;  %v2798_v29 = vld [vmem:[%s3451_s10 + $0x24] sm:$0xff]  }
  0x89   : > { %v1845_v10 = vor.u32 %v1844_v41, %v1840_v7  ;;  %v1801_v30 = vrot.slane %v1799_v51, 1  ;;  %v1852_v28 = vshrl.u32 %v2796_v4, 16  ;;  %v1854_v0 = vshll.u32 %v2796_v4, 16  ;;  %v2799_v6 = vld [vmem:[%s3451_s10 + $0x2c] ss:$0 sps:$4 sm:$0x11]  }
  0x8a   : > { %1442 = vrot.lane.b32.xlu1 %v1407_v15, %s2975_s24  ;;  %1434 = vrot.lane.b32.xlu0 %v1359_v32, %s2975_s24  ;;  %v1797_v25 = vor.u32 %v1796_v53, %v1792_v38  ;;  %v1859_v26 = vshll.u32 %v2797_v17, 16  ;;  %v1804_v43 = vshrl.u32 %v2798_v29, 16  ;;  %v1806_v35 = vshll.u32 %v2798_v29, 16  ;;  %v2800_v46 = vld [vmem:[%s3451_s10 + $0x48] sm:$0xfe]   ;;  %v2806_v18 = vld [vmem:[%s3451_s10 + $0x18] sm:$0xff]  }
  0x8b   : > { %v1850_v34 = vsel %vm879_vm9, %v1845_v10, %v1849_v49  ;;  %v1856_v39 = vrot.slane %v1854_v0, 1  ;;  %v1811_v57 = vshll.u32 %v2799_v6, 16  ;;  %v2804_v50 = vld [vmem:[%s3451_s10 + $0x48] sm:$0xff]   ;;  %v2801_v52 = vld [vmem:[%s3451_s10 + $0x50] ss:$0 sps:$4 sm:$0x11]  }
  0x8c   : > { %v1861_v48 = vrot.slane %v1859_v26, 1  ;;  %v1802_v21 = vsel %vm879_vm9, %v1797_v25, %v1801_v30  ;;  %v1808_v54 = vrot.slane %v1806_v35, 1  ;;  %v2020_v2 = vrot.slane %v2800_v46, 1  ;;  %v2802_v42 = vld [vmem:[%s3451_s10 + $0x18] sm:$0xfe]   ;;  %v2814_v53 = vld [vmem:[%s3451_s10 + $0x24] sm:$0xff]  }
  0x8d   : > { %v1857_v62 = vor.u32 %v1856_v39, %v1852_v28  ;;  %v1813_v63 = vrot.slane %v1811_v57, 1  ;;  %v2021_v22 = vrot.slane %v2801_v52, 1  ;;  %v2803_v1 = vld [vmem:[%s3451_s10 + $0x20] ss:$0 sps:$4 sm:$0x11]   ;;  %v2008_v40 = vrot.slane %v2802_v42, 1 }
  0x8e   : > { %1585 = vrot.lane.b32.xlu1 %v1567_v61, %s2976_s27  ;;  %1577 = vrot.lane.b32.xlu0 %v1555_v47, %s2976_s27  ;;  %v1809_v15 = vor.u32 %v1808_v54, %v1804_v43  ;;  %v2009_v32 = vrot.slane %v2803_v1, 1  ;;  %v2805_v61 = vld [vmem:[%s3451_s10 + $0x50] ss:$0 sps:$4 sm:$0x11]   ;;  %v2812_v16 = vld [vmem:[%s3451_s10 + $0x54] sm:$0xff]   ;;  %v953_v19 = vshrl.u32 %v2804_v50, 16 }
  0x8f   : > { %v1862_v12 = vsel %vm879_vm9, %v1857_v62, %v1861_v48  ;;  %v2022_v13 = vsel %vm1097_vm8, %v2020_v2, %v2021_v22  ;;  %v955_v36 = vshll.u32 %v2804_v50, 16  ;;  %v960_v47 = vshll.u32 %v2805_v61, 16  ;;  %v2807_v58 = vld [vmem:[%s3451_s10 + $0x20] ss:$0 sps:$4 sm:$0x11]   ;;  %v2824_v61 = vld [vmem:[%s3451_s10 + $0x54] sm:$0xff]  }
  0x90   : > { %v1814_v55 = vsel %vm879_vm9, %v1809_v15, %v1813_v63  ;;  %v905_v11 = vshrl.u32 %v2806_v18, 16  ;;  %v907_v27 = vshll.u32 %v2806_v18, 16  ;;  %v965_v33 = vshrl.u32 %v2812_v16, 16  ;;  %v2810_v60 = vld [vmem:[%s3451_s10 + $0x24] sm:$0xfe]  }
  0x91   : > { %v957_v3 = vrot.slane %v955_v36, 1  ;;  %v962_v8 = vrot.slane %v960_v47, 1  ;;  %v967_v5 = vshll.u32 %v2812_v16, 16  ;;  %v2811_v56 = vld [vmem:[%s3451_s10 + $0x2c] ss:$0 sps:$4 sm:$0x11]  }
  0x92   : > { %1587 = vrot.lane.b32.xlu1 %v1570_v20, %s2976_s27  ;;  %1579 = vrot.lane.b32.xlu0 %v1558_v44, %s2976_s27  ;;  %v912_v20 = vshll.u32 %v2807_v58, 16  ;;  %v909_v59 = vrot.slane %v907_v27, 1  ;;  %v2808_v44 = vld [vmem:[%s3451_s10 + $0x54] sm:$0xfe]   ;;  %v2011_v49 = vrot.slane %v2810_v60, 1  ;;  %v2012_v51 = vrot.slane %v2811_v56, 1 }
  0x93   : > { %v958_v37 = vor.u32 %v957_v3, %v953_v19  ;;  %v2023_v38 = vrot.slane %v2808_v44, 1  ;;  %v969_v45 = vrot.slane %v967_v5, 1  ;;  %v2813_v4 = vld [vmem:[%s3451_s10 + $0x5c] ss:$0 sps:$4 sm:$0x11]   ;;  %v917_v17 = vshrl.u32 %v2814_v53, 16 }
  0x94   : > { %v910_v14 = vor.u32 %v909_v59, %v905_v11  ;;  %v919_v29 = vshll.u32 %v2814_v53, 16  ;;  %v2013_v25 = vsel %vm1097_vm8, %v2011_v49, %v2012_v51  ;;  %v2815_v28 = vld [vmem:[%s3451_s10 + $0x2c] ss:$0 sps:$4 sm:$0x11]   ;;  %v2818_v50 = vld [vmem:[%s3451_s10 + $0x18] sm:$0xfe]  }
  0x95   : > { %v963_v7 = vsel %vm879_vm9, %v958_v37, %v962_v8  ;;  %v970_v30 = vor.u32 %v969_v45, %v965_v33  ;;  %v924_v6 = vshll.u32 %v2815_v28, 16  ;;  %v2816_v43 = vld [vmem:[%s3451_s10 + $0x48] sm:$0xfe]   ;;  %v2817_v39 = vld [vmem:[%s3451_s10 + $0x50] ss:$0 sps:$4 sm:$0x11]  }
  0x96   : > { %1678 = vrot.lane.b32.xlu1 %v2788_v23, %s2977_s28  ;;  %1670 = vrot.lane.b32.xlu0 %v2789_v31, %s2977_s28  ;;  %v2010_v23 = vsel %vm1097_vm8, %v2008_v40, %v2009_v32  ;;  %v2809_v31 = vld [vmem:[%s3451_s10 + $0x5c] ss:$0 sps:$4 sm:$0x11]   ;;  %v921_v0 = vrot.slane %v919_v29, 1  ;;  %v1116_v46 = vrot.slane %v2816_v43, 1  ;;  %v1104_v62 = vrot.slane %v2818_v50, 1 }
  0x97   : > { %v2024_v41 = vrot.slane %v2809_v31, 1  ;;  %v926_v57 = vrot.slane %v924_v6, 1  ;;  %v2819_v54 = vld [vmem:[%s3451_s10 + $0x20] ss:$0 sps:$4 sm:$0x11]   ;;  %v2828_v16 = vld [vmem:[%s3451_s10 + $0x54] sm:$0xff]  }
  0x98   : > { %v922_v35 = vor.u32 %v921_v0, %v917_v17  ;;  %v1105_v2 = vrot.slane %v2819_v54, 1  ;;  %v2820_v18 = vld [vmem:[%s3451_s10 + $0x54] sm:$0xfe]   ;;  %v2821_v15 = vld [vmem:[%s3451_s10 + $0x5c] ss:$0 sps:$4 sm:$0x11]  }
  0x99   : > { %v2025_v10 = vsel %vm1097_vm8, %v2023_v38, %v2024_v41  ;;  %v1119_v42 = vrot.slane %v2820_v18, 1  ;;  %v1120_v1 = vrot.slane %v2821_v15, 1  ;;  %v2830_v19 = vld [vmem:[%s3451_s10 + $0x24] sm:$0xff]   ;;  %v1409_v58 = vshrl.u32 %v2828_v16, 16  ;;  %v2834_v38 = vld [vmem:[%s3451_s10 + $0x30] sm:$0xff]  }
  0x9a   : > { %1680 = vrot.lane.b32.xlu1 %v2790_v24, %s2977_s28  ;;  %1672 = vrot.lane.b32.xlu0 %v2791_v9, %s2977_s28  ;;  %v914_v24 = vrot.slane %v912_v20, 1  ;;  %v927_v52 = vsel %vm879_vm9, %v922_v35, %v926_v57  ;;  %v1106_v22 = vsel %vm1097_vm8, %v1104_v62, %v1105_v2  ;;  %v2825_v36 = vld [vmem:[%s3451_s10 + $0x24] sm:$0xff]   ;;  %v1411_v3 = vshll.u32 %v2828_v16, 16  ;;  %v2829_v27 = vld [vmem:[%s3451_s10 + $0x5c] ss:$0 sps:$4 sm:$0x11]  }
  0x9b   : > { %v1121_v40 = vsel %vm1097_vm8, %v1119_v42, %v1120_v1  ;;  %v2826_v11 = vld [vmem:[%s3451_s10 + $0x60] sm:$0xff]   ;;  %v1361_v33 = vshrl.u32 %v2830_v19, 16  ;;  %v1363_v8 = vshll.u32 %v2830_v19, 16  ;;  %v2827_v20 = vld [vmem:[%s3451_s10 + $0x30] sm:$0xff]   ;;  %v1416_v37 = vshll.u32 %v2829_v27, 16 }
  0x9c   : > { %v915_v9 = vsel %vm879_vm9, %v910_v14, %v914_v24  ;;  %v2831_v59 = vld [vmem:[%s3451_s10 + $0x2c] ss:$0 sps:$4 sm:$0x11]   ;;  %v2832_v24 = vld [vmem:[%s3451_s10 + $0x60] sm:$0xff]   ;;  %v1373_v51 = vshrl.u32 %v2834_v38, 16  ;;  %v2850_v1 = vld [vmem:[%s3451_s10 + $0x30] sm:$0xff]  }
  0x9d   : > { %v1365_v31 = vrot.slane %v1363_v8, 1  ;;  %v1418_v5 = vrot.slane %v1416_v37, 1  ;;  %v2833_v14 = vld [vmem:[%s3451_s10 + $0x68] ss:$0 sps:$4 sm:$0x11]   ;;  %v1421_v60 = vshrl.u32 %v2832_v24, 16 }
  0x9e   : > { %1895 = vrot.lane.b32.xlu1 %v1850_v34, %s2978_s29  ;;  %1887 = vrot.lane.b32.xlu0 %v1802_v21, %s2978_s29  ;;  %v972_v34 = vshll.u32 %v2813_v4, 16  ;;  %v1117_v21 = vrot.slane %v2817_v39, 1  ;;  %v1423_v56 = vshll.u32 %v2832_v24, 16  ;;  %v2835_v53 = vld [vmem:[%s3451_s10 + $0x38] ss:$0 sps:$4 sm:$0x11]  }
  0x9f   : > { %v1366_v41 = vor.u32 %v1365_v31, %v1361_v33  ;;  %v1375_v4 = vshll.u32 %v2834_v38, 16  ;;  %v2836_v28 = vld [vmem:[%s3451_s10 + $0x54] sm:$0xfe]   ;;  %v2837_v0 = vld [vmem:[%s3451_s10 + $0x5c] ss:$0 sps:$4 sm:$0x11]  }
  0xa0   : > { %v974_v26 = vrot.slane %v972_v34, 1  ;;  %v1118_v63 = vsel %vm1097_vm8, %v1116_v46, %v1117_v21  ;;  %v1425_v49 = vrot.slane %v1423_v56, 1  ;;  %v1380_v34 = vshll.u32 %v2835_v53, 16  ;;  %v2839_v57 = vld [vmem:[%s3451_s10 + $0x2c] ss:$0 sps:$4 sm:$0x11]  }
  0xa1   : > { %v1571_v35 = vrot.slane %v2836_v28, 1  ;;  %v1572_v39 = vrot.slane %v2837_v0, 1  ;;  %v1560_v21 = vrot.slane %v2839_v57, 1  ;;  %v2840_v54 = vld [vmem:[%s3451_s10 + $0x60] sm:$0xfe]   ;;  %v2845_v19 = vld [vmem:[%s3451_s10 + $0x30] sm:$0xff]  }
  0xa2   : > { %1897 = vrot.lane.b32.xlu1 %v1862_v12, %s2978_s29  ;;  %1889 = vrot.lane.b32.xlu0 %v1814_v55, %s2978_s29  ;;  %v975_v48 = vsel %vm879_vm9, %v970_v30, %v974_v26  ;;  %v2822_v12 = vld [vmem:[%s3451_s10 + $0x24] sm:$0xfe]   ;;  %v2823_v55 = vld [vmem:[%s3451_s10 + $0x2c] ss:$0 sps:$4 sm:$0x11]   ;;  %v1377_v30 = vrot.slane %v1375_v4, 1 }
  0xa3   : > { %v1107_v32 = vrot.slane %v2822_v12, 1  ;;  %v1382_v43 = vrot.slane %v1380_v34, 1  ;;  %v2841_v62 = vld [vmem:[%s3451_s10 + $0x68] ss:$0 sps:$4 sm:$0x11]   ;;  %v1574_v2 = vrot.slane %v2840_v54, 1 }
  0xa4   : > { %v1378_v6 = vor.u32 %v1377_v30, %v1373_v51  ;;  %v2842_v18 = vld [vmem:[%s3451_s10 + $0x30] sm:$0xfe]   ;;  %v2843_v42 = vld [vmem:[%s3451_s10 + $0x38] ss:$0 sps:$4 sm:$0x11]   ;;  %v2844_v16 = vld [vmem:[%s3451_s10 + $0x60] sm:$0xff]  }
  0xa5   : > { %v1562_v12 = vrot.slane %v2842_v18, 1  ;;  %v2851_v33 = vld [vmem:[%s3451_s10 + $0x38] ss:$0 sps:$4 sm:$0x11]   ;;  %v2852_v8 = vld [vmem:[%s3451_s10 + $0x6c] sm:$0xff]   ;;  %v2854_v31 = vld [vmem:[%s3451_s10 + $0x3c] sm:$0xff]  }
  0xa6   : > { %2040 = vrot.lane.b32.xlu1 %v2022_v13, %s2979_s4  ;;  %2032 = vrot.lane.b32.xlu0 %v2010_v23, %s2979_s4  ;;  %v1108_v13 = vrot.slane %v2823_v55, 1  ;;  %v1413_v23 = vrot.slane %v1411_v3, 1  ;;  %v1383_v46 = vsel %vm879_vm9, %v1378_v6, %v1382_v43  ;;  %v1818_v3 = vshll.u32 %v2850_v1, 16  ;;  %v2856_v30 = vld [vmem:[%s3451_s10 + $0x60] sm:$0xfe]  }
  0xa7   : > { %v2857_v34 = vld [vmem:[%s3451_s10 + $0x68] ss:$0 sps:$4 sm:$0x11]   ;;  %v2026_v43 = vrot.slane %v2856_v30, 1  ;;  %v2860_v54 = vld [vmem:[%s3451_s10 + $0x6c] sm:$0xfe]  }
  0xa8   : > { %v1109_v47 = vsel %vm1097_vm8, %v1107_v32, %v1108_v13  ;;  %v1414_v44 = vor.u32 %v1413_v23, %v1409_v58  ;;  %v1563_v32 = vrot.slane %v2843_v42, 1  ;;  %v1816_v58 = vshrl.u32 %v2850_v1, 16  ;;  %v2859_v57 = vld [vmem:[%s3451_s10 + $0x38] ss:$0 sps:$4 sm:$0x11]  }
  0xa9   : > { %v1820_v23 = vrot.slane %v1818_v3, 1  ;;  %v2029_v18 = vrot.slane %v2860_v54, 1  ;;  %v2869_v3 = vld [vmem:[%s3451_s10 + $0x18] sm:$0xff]  }
  0xaa   : > { %988 = vrot.lane.b32.xlu1 %v963_v7, %s2974_s21  ;;  %980 = vrot.lane.b32.xlu0 %v915_v9, %s2974_s21  ;;  %v1368_v7 = vshll.u32 %v2831_v59, 16  ;;  %v1428_v9 = vshll.u32 %v2833_v14, 16  ;;  %v1564_v13 = vsel %vm1097_vm8, %v1562_v12, %v1563_v32  ;;  %v1823_v59 = vshll.u32 %v2851_v33, 16  ;;  %v2863_v12 = vld [vmem:[%s3451_s10 + $0x44] ss:$0 sps:$4 sm:$0x11]  }
  0xab   : > { %v1821_v56 = vor.u32 %v1820_v23, %v1816_v58  ;;  %785 = vst.msk [vmem:[#allocation3 + $0x10] sm:$0xff] %vm782_vm10, %v2869_v3  ;;  %v2872_v33 = vld [vmem:[%s3451_s10 + $0x54] sm:$0xff]  }
  0xac   : > { %v1370_v45 = vrot.slane %v1368_v7, 1  ;;  %v1430_v17 = vrot.slane %v1428_v9, 1  ;;  %v1878_v7 = vshll.u32 %v2852_v8, 16  ;;  %v1825_v14 = vrot.slane %v1823_v59, 1  ;;  %790 = vst.msk [vmem:[#allocation3 + $0x38] sm:$0xff] %vm782_vm10, %v2872_v33 }
  0xae   : > { %2042 = vrot.lane.b32.xlu1 %v2025_v10, %s2979_s4  ;;  %2034 = vrot.lane.b32.xlu0 %v2013_v25, %s2979_s4  ;;  %v1419_v10 = vsel %vm879_vm9, %v1414_v44, %v1418_v5  ;;  %v1371_v29 = vsel %vm879_vm9, %v1366_v41, %v1370_v45  ;;  %v1426_v25 = vor.u32 %v1425_v49, %v1421_v60  ;;  %v2853_v44 = vld [vmem:[%s3451_s10 + $0x74] ss:$0 sps:$4 sm:$0x11]   ;;  %v1876_v5 = vshrl.u32 %v2852_v8, 16  ;;  %v2864_v60 = vld [vmem:[%s3451_s10 + $0xc] sm:$0xff]  }
  0xaf   : > { %v1883_v38 = vshll.u32 %v2853_v44, 16  ;;  %v1828_v41 = vshrl.u32 %v2854_v31, 16  ;;  %v1880_v9 = vrot.slane %v1878_v7, 1  ;;  %v1830_v49 = vshll.u32 %v2854_v31, 16  ;;  %784 = vst.msk [vmem:[#allocation3 + $0x8] sm:$0xff] %vm782_vm10, %v2864_v60  ;;  %v2873_v8 = vld [vmem:[%s3451_s10 + $0x24] sm:$0xff]  }
  0xb0   : > { %v1431_v26 = vsel %vm879_vm9, %v1426_v25, %v1430_v17  ;;  %v1826_v28 = vsel %vm879_vm9, %v1821_v56, %v1825_v14  ;;  %786 = vst.msk [vmem:[#allocation3 + $0x18] sm:$0xff] %vm782_vm10, %v2873_v8 }
  0xb1   : > { %v1885_v51 = vrot.slane %v1883_v38, 1  ;;  %v1881_v17 = vor.u32 %v1880_v9, %v1876_v5 }
  0xb2   : > { %990 = vrot.lane.b32.xlu1 %v975_v48, %s2974_s21  ;;  %982 = vrot.lane.b32.xlu0 %v927_v52, %s2974_s21  ;;  %v2838_v48 = vld [vmem:[%s3451_s10 + $0x24] sm:$0xfe]   ;;  %v1573_v52 = vsel %vm1097_vm8, %v1571_v35, %v1572_v39  ;;  %v2027_v39 = vrot.slane %v2857_v34, 1 }
  0xb3   : > { %v1559_v50 = vrot.slane %v2838_v48, 1  ;;  %v2858_v48 = vld [vmem:[%s3451_s10 + $0x30] sm:$0xfe]  }
  0xb4   : > { %v2028_v42 = vsel %vm1097_vm8, %v2026_v43, %v2027_v39 }
  0xb5   : > { %v1561_v15 = vsel %vm1097_vm8, %v1559_v50, %v1560_v21  ;;  %v2014_v50 = vrot.slane %v2858_v48, 1  ;;  %v2015_v21 = vrot.slane %v2859_v57, 1 }
  0xb6   : > { %1134 = vrot.lane.b32.xlu1 %v1118_v63, %s2973_s20  ;;  %1126 = vrot.lane.b32.xlu0 %v1106_v22, %s2973_s20  ;;  %v2848_v63 = vld [vmem:[%s3451_s10 + $0x60] sm:$0xff]   ;;  %v1575_v22 = vrot.slane %v2841_v62, 1 }
  0xb7   : > { %v1864_v55 = vshrl.u32 %v2848_v63, 16  ;;  %v2016_v32 = vsel %vm1097_vm8, %v2014_v50, %v2015_v21 }
  0xba   : > { %1136 = vrot.lane.b32.xlu1 %v1121_v40, %s2973_s20  ;;  %1128 = vrot.lane.b32.xlu0 %v1109_v47, %s2973_s20  ;;  %v1576_v40 = vsel %vm1097_vm8, %v1574_v2, %v1575_v22  ;;  %v2865_v2 = vld [vmem:[%s3451_s10] sm:$0xff]  }
  0xbb   : > { %v2866_v22 = vld [vmem:[%s3451_s10 + $0x3c] sm:$0xff]   ;;  %783 = vst.msk [vmem:[#allocation3] sm:$0xff] %vm782_vm10, %v2865_v2 }
  0xbc   : > { %788 = vst.msk [vmem:[#allocation3 + $0x28] sm:$0xff] %vm782_vm10, %v2866_v22 }
  0xbe   : > { %1227 = vrot.lane.b32.xlu1 %v2824_v61, %s2972_s11  ;;  %1219 = vrot.lane.b32.xlu0 %v2825_v36, %s2972_s11  ;;  %v1866_v61 = vshll.u32 %v2848_v63, 16  ;;  %v2849_v36 = vld [vmem:[%s3451_s10 + $0x68] ss:$0 sps:$4 sm:$0x11]  }
  0xbf   : > { %v1871_v27 = vshll.u32 %v2849_v36, 16  ;;  %v2861_v63 = vld [vmem:[%s3451_s10 + $0x74] ss:$0 sps:$4 sm:$0x11]   ;;  %v2868_v36 = vld [vmem:[%s3451_s10 + $0x48] sm:$0xff]  }
  0xc0   : > { %v1868_v47 = vrot.slane %v1866_v61, 1  ;;  %v2030_v1 = vrot.slane %v2861_v63, 1  ;;  %789 = vst.msk [vmem:[#allocation3 + $0x30] sm:$0xff] %vm782_vm10, %v2868_v36 }
  0xc1   : > { %v1873_v37 = vrot.slane %v1871_v27, 1  ;;  %v2871_v27 = vld [vmem:[%s3879_s1 + $0x8] sm:$0xff]  }
  0xc2   : > { %1229 = vrot.lane.b32.xlu1 %v2826_v11, %s2972_s11  ;;  %1221 = vrot.lane.b32.xlu0 %v2827_v20, %s2972_s11  ;;  %v2846_v11 = vld [vmem:[%s3451_s10 + $0x6c] sm:$0xff]   ;;  %v2847_v20 = vld [vmem:[%s3451_s10 + $0x3c] sm:$0xff]   ;;  %v1869_v24 = vor.u32 %v1868_v47, %v1864_v55 }
  0xc4   : > { %v1874_v4 = vsel %vm879_vm9, %v1869_v24, %v1873_v37 }
  0xc6   : > { %1444 = vrot.lane.b32.xlu1 %v1419_v10, %s2975_s24  ;;  %1436 = vrot.lane.b32.xlu0 %v1371_v29, %s2975_s24  ;;  %v2855_v10 = vld [vmem:[%s3451_s10 + $0x44] ss:$0 sps:$4 sm:$0x11]   ;;  %v1832_v29 = vrot.slane %v1830_v49, 1 }
  0xc7   : > { %v1835_v25 = vshll.u32 %v2855_v10, 16 }
  0xc8   : > { %v1833_v0 = vor.u32 %v1832_v29, %v1828_v41 }
  0xca   : > { %1446 = vrot.lane.b32.xlu1 %v1431_v26, %s2975_s24  ;;  %1438 = vrot.lane.b32.xlu0 %v1383_v46, %s2975_s24  ;;  %v1837_v26 = vrot.slane %v1835_v25, 1  ;;  %v1886_v46 = vsel %vm879_vm9, %v1881_v17, %v1885_v51 }
  0xce   : > { %1589 = vrot.lane.b32.xlu1 %v1573_v52, %s2976_s27  ;;  %1581 = vrot.lane.b32.xlu0 %v1561_v15, %s2976_s27  ;;  %v1838_v52 = vsel %vm879_vm9, %v1833_v0, %v1837_v26  ;;  %v2862_v15 = vld [vmem:[%s3451_s10 + $0x3c] sm:$0xfe]  }
  0xcf   : > { %v2017_v61 = vrot.slane %v2862_v15, 1 }
  0xd2   : > { %1591 = vrot.lane.b32.xlu1 %v1576_v40, %s2976_s27  ;;  %1583 = vrot.lane.b32.xlu0 %v1564_v13, %s2976_s27  ;;  %v2867_v40 = vld [vmem:[%s3451_s10 + $0x30] sm:$0xff]   ;;  %s175_s10 = sand.u32 1, %s2945_s13  }
  0xd3   : > { %787 = vst.msk [vmem:[#allocation3 + $0x20] sm:$0xff] %vm782_vm10, %v2867_v40  ;;  %s2350_s21 = sshll.u32 %s175_s10, 7  ;;  %s3825_s9 = scalar_lea.sflag [#allocation5], %s175_s10 }
  0xd6   : > { %1682 = vrot.lane.b32.xlu1 %v2844_v16, %s2977_s28  ;;  %1674 = vrot.lane.b32.xlu0 %v2845_v19, %s2977_s28  ;;  %v2018_v16 = vrot.slane %v2863_v12, 1  ;;  %v2031_v19 = vsel %vm1097_vm8, %v2029_v18, %v2030_v1 }
  0xd8   : > { %v2019_v58 = vsel %vm1097_vm8, %v2017_v61, %v2018_v16 }
  0xda   : > { %1684 = vrot.lane.b32.xlu1 %v2846_v11, %s2977_s28  ;;  %1676 = vrot.lane.b32.xlu0 %v2847_v20, %s2977_s28  ;;  %v2870_v11 = vld [vmem:[%s3879_s1] sm:$0xff]   ;;  %v2874_v20 = vld [vmem:[%s3879_s1 + $0x10] ss:$0 sps:$4 sm:$0x33]   ;;  %s3795_s28 = scalar_lea.vmem [#allocation4], %s2350_s21  ;;  %s2980_s21 = smov [#allocation4]  }
  0xdb   : > { %2641 = vmatprep.subr.bf16.mxu0 %v2870_v11  ;;  %2663 = vmatprep.subr.bf16.mxu1 %v2870_v11  ;;  %v2127_v59 = vsel %vm2125_vm14, %v2874_v20, 0  ;;  %s2879_s24 = sshll.u32 %s2980_s21, 4  ;;  %s2880_s24 = int_to_ptr.vmem [resolvable:$false] %s2879_s24 }
  0xdc   : > { %2642 = vmatpush3.bf16.msra.mxu0 %v2870_v11  ;;  %2666 = vmatpush3.bf16.msra.mxu1 %v2870_v11  ;;  %s2881_s27 = scalar_lea.vmem %s2880_s24, 4096 }
  0xdd   : > { %2643 = vmatprep.subr.bf16.mxu0 %v2871_v27  ;;  %2664 = vmatprep.subr.bf16.mxu1 %v2871_v27 }
  0xde   : > { %1899 = vrot.lane.b32.xlu1 %v1874_v4, %s2978_s29  ;;  %1891 = vrot.lane.b32.xlu0 %v1826_v28, %s2978_s29 }
  0xe0   : > { %v3651_v45 = vpop.permute.xlu1 %1223  ;;  %v3655_v53 = vpop.permute.xlu0 %1215  ;;  %2644 = vmatpush3.bf16.msra.mxu0 %v2871_v27  ;;  %2667 = vmatpush3.bf16.msra.mxu1 %v2871_v27 }
  0xe1   : > { %2669 = vmatprep.subr.msk.bf16.mxu0 %vm2125_vm14, %v2874_v20  ;;  %2670 = vmatprep.subr.msk.bf16.mxu1 %vm2125_vm14, %v2874_v20 }
  0xe2   : > { %1901 = vrot.lane.b32.xlu1 %v1886_v46, %s2978_s29  ;;  %1893 = vrot.lane.b32.xlu0 %v1838_v52, %s2978_s29  ;;  %s2629_s29 = sshll.u32 %s2953_s15, 4  ;;  %s2259_s15 = sshll.u32 %s3795_s28, 4  ;;  %s3819_s15 = int_to_ptr.vmem [resolvable:$true] %s2259_s15 }
  0xe3   : > { %s2875_s11 = scalar_lea.vmem %s3819_s15, 2048  ;;  %p2882_p2 = scmp.lt.s32.totalorder %s3819_s15, %s2880_s24 }
  0xe4   : > { %v3663_v6 = vpop.permute.xlu1 %1225  ;;  %v3666_v35 = vpop.permute.xlu0 %1217  ;;  %2646 = vmatpush3.bf16.msra.mxu0 %v2127_v59  ;;  %2668 = vmatpush3.bf16.msra.mxu1 %v2127_v59  ;;  %p2876_p13 = scmp.ne.s32.totalorder %s3819_s15, %s2875_s11  ;;  %p2883_p4 = scmp.lt.s32.totalorder %s2881_s27, %s2875_s11 }
  0xe6   : > { %2044 = vrot.lane.b32.xlu1 %v2028_v42, %s2979_s4  ;;  %2036 = vrot.lane.b32.xlu0 %v2016_v32, %s2979_s4  ;;  %p2877_p0 = pnand %p2876_p13, %p3053_p3  ;;  %p2884_p5 = por %p2883_p4, %p2882_p2 }
  0xe8   : > { %v3674_v62 = vpop.permute.xlu1 %1130  ;;  %v1123_v55 = vpop.permute.xlu0 %1122  ;;  %p2878_p1 = pneg %p2877_p0 }
  0xea   : > { %2046 = vrot.lane.b32.xlu1 %v2031_v19, %s2979_s4  ;;  %2038 = vrot.lane.b32.xlu0 %v2019_v58, %s2979_s4  ;;  %s2623_s4 = sshll.u32 %s2957_s16, 5  ;;  %p2885_p6 = pnand %p2884_p5, %p2878_p1 }
  0xeb   : > { %s2256_s5 = sadd.s32 %s2629_s29, %s2623_s4 }
  0xec   : > { %v1133_v13 = vpop.permute.xlu1 %1132  ;;  %v1125_v47 = vpop.permute.xlu0 %1124  ;;  %s2624_s6 = sshll.u32 %s2256_s5, 7 }
  0xed   : > { %s3815_s8 = scalar_lea.hbm %s3881_s3, %s2624_s6 }
  0xf0   : > { %v979_v23 = vpop.permute.xlu1 %978  ;;  %v977_v37 = vpop.permute.xlu0 %976 }
  0xf1   : > { %1002 = vst.msk [vmem:[#allocation3 + $0x8] sm:$0xff] %vm1000_vm11, %v979_v23  ;;  %1001 = vst.msk [vmem:[#allocation3] sm:$0xff] %vm1000_vm11, %v977_v37  ;;  %v2608_v37 = vld [vmem:[%s3880_s2] ss:$0 sm:$0xff] }
  0xf2   : > { %1148 = vst.msk [vmem:[#allocation3 + $0x8] sm:$0xff] %vm1146_vm12, %v1125_v47  ;;  %1147 = vst.msk [vmem:[#allocation3] sm:$0xff] %vm1146_vm12, %v1123_v55 }
  0xf3   : > { %1241 = vst.msk [vmem:[#allocation3 + $0x8] sm:$0xff] %vm1239_vm13, %v3666_v35  ;;  %1240 = vst.msk [vmem:[#allocation3] sm:$0xff] %vm1239_vm13, %v3655_v53 }
  0xf4   : > { %v987_v44 = vpop.permute.xlu1 %986  ;;  %v985_v31 = vpop.permute.xlu0 %984 }
  0xf5   : > { %1006 = vst.msk [vmem:[#allocation3 + $0x28] sm:$0xff] %vm1000_vm11, %v987_v44  ;;  %1005 = vst.msk [vmem:[#allocation3 + $0x20] sm:$0xff] %vm1000_vm11, %v985_v31 }
  0xf6   : > { %1152 = vst.msk [vmem:[#allocation3 + $0x28] sm:$0xff] %vm1146_vm12, %v1133_v13  ;;  %1151 = vst.msk [vmem:[#allocation3 + $0x20] sm:$0xff] %vm1146_vm12, %v3674_v62 }
  0xf7   : > { %1245 = vst.msk [vmem:[#allocation3 + $0x28] sm:$0xff] %vm1239_vm13, %v3663_v6  ;;  %1244 = vst.msk [vmem:[#allocation3 + $0x20] sm:$0xff] %vm1239_vm13, %v3651_v45 }
  0xf8   : > { %v1441_v24 = vpop.permute.xlu1 %1440  ;;  %v1433_v5 = vpop.permute.xlu0 %1432 }
  0xf9   : > { %1461 = vst.msk [vmem:[#allocation3 + $0x20] sm:$0xff] %vm1456_vm15, %v1441_v24  ;;  %1457 = vst.msk [vmem:[#allocation3] sm:$0xff] %vm1456_vm15, %v1433_v5 }
  0xfc   : > { %v1443_v7 = vpop.permute.xlu1 %1442  ;;  %v1435_v14 = vpop.permute.xlu0 %1434 }
  0xfd   : > { %1462 = vst.msk [vmem:[#allocation3 + $0x28] sm:$0xff] %vm1456_vm15, %v1443_v7  ;;  %1458 = vst.msk [vmem:[#allocation3 + $0x8] sm:$0xff] %vm1456_vm15, %v1435_v14 }
 0x100   : > { %v1586_v38 = vpop.permute.xlu1 %1585  ;;  %v1578_v41 = vpop.permute.xlu0 %1577 }
 0x101   : > { %1606 = vst.msk [vmem:[#allocation3 + $0x20] sm:$0xff] %vm1601_vm0, %v1586_v38  ;;  %1602 = vst.msk [vmem:[#allocation3] sm:$0xff] %vm1601_vm0, %v1578_v41 }
 0x104   : > { %v1588_v60 = vpop.permute.xlu1 %1587  ;;  %v1580_v56 = vpop.permute.xlu0 %1579 }
 0x105   : > { %1607 = vst.msk [vmem:[#allocation3 + $0x28] sm:$0xff] %vm1601_vm0, %v1588_v60  ;;  %1603 = vst.msk [vmem:[#allocation3 + $0x8] sm:$0xff] %vm1601_vm0, %v1580_v56 }
 0x108   : > { %v1679_v45 = vpop.permute.xlu1 %1678  ;;  %v1671_v9 = vpop.permute.xlu0 %1670 }
 0x109   : > { %1699 = vst.msk [vmem:[#allocation3 + $0x20] sm:$0xff] %vm1694_vm1, %v1679_v45  ;;  %1695 = vst.msk [vmem:[#allocation3] sm:$0xff] %vm1694_vm1, %v1671_v9 }
 0x10c   : > { %v1681_v10 = vpop.permute.xlu1 %1680  ;;  %v1673_v49 = vpop.permute.xlu0 %1672 }
 0x10d   : > { %1700 = vst.msk [vmem:[#allocation3 + $0x28] sm:$0xff] %vm1694_vm1, %v1681_v10  ;;  %1696 = vst.msk [vmem:[#allocation3 + $0x8] sm:$0xff] %vm1694_vm1, %v1673_v49 }
 0x110   : > { %v1896_v53 = vpop.permute.xlu1 %1895  ;;  %v1888_v51 = vpop.permute.xlu0 %1887 }
 0x111   : > { %1916 = vst.msk [vmem:[#allocation3 + $0x20] sm:$0xff] %vm1911_vm2, %v1896_v53  ;;  %1912 = vst.msk [vmem:[#allocation3] sm:$0xff] %vm1911_vm2, %v1888_v51 }
 0x114   : > { %v1898_v4 = vpop.permute.xlu1 %1897  ;;  %v1890_v17 = vpop.permute.xlu0 %1889 }
 0x115   : > { %1917 = vst.msk [vmem:[#allocation3 + $0x28] sm:$0xff] %vm1911_vm2, %v1898_v4  ;;  %1913 = vst.msk [vmem:[#allocation3 + $0x8] sm:$0xff] %vm1911_vm2, %v1890_v17 }
 0x118   : > { %v2041_v29 = vpop.permute.xlu1 %2040  ;;  %v2033_v25 = vpop.permute.xlu0 %2032 }
 0x119   : > { %2061 = vst.msk [vmem:[#allocation3 + $0x20] sm:$0xff] %vm2056_vm3, %v2041_v29  ;;  %2057 = vst.msk [vmem:[#allocation3] sm:$0xff] %vm2056_vm3, %v2033_v25 }
 0x11c   : > { %v989_v30 = vpop.permute.xlu1 %988  ;;  %v981_v34 = vpop.permute.xlu0 %980 }
 0x11d   : > { %1007 = vst.msk [vmem:[#allocation3 + $0x30] sm:$0xff] %vm1000_vm11, %v989_v30  ;;  %1003 = vst.msk [vmem:[#allocation3 + $0x10] sm:$0xff] %vm1000_vm11, %v981_v34 }
 0x120   : > { %v2043_v28 = vpop.permute.xlu1 %2042  ;;  %v2069_v0 = vld [vmem:[#allocation3 + $0x20] sm:$0xff]  ;;  %v2035_v26 = vpop.permute.xlu0 %2034 }
 0x121   : > { %2062 = vst.msk [vmem:[#allocation3 + $0x28] sm:$0xff] %vm2056_vm3, %v2043_v28  ;;  %2655 = vmatprep.mubr.msk.bf16.mxu1 %vm2100_vm4, %v2069_v0  ;;  %v2065_v6 = vld [vmem:[#allocation3] sm:$0xff]  ;;  %2058 = vst.msk [vmem:[#allocation3 + $0x8] sm:$0xff] %vm2056_vm3, %v2035_v26 }
 0x122   : > { %2647 = vmatprep.mubr.msk.bf16.mxu0 %vm2100_vm4, %v2065_v6 }
 0x124   : > { %v991_v43 = vpop.permute.xlu1 %990  ;;  %v983_v35 = vpop.permute.xlu0 %982 }
 0x125   : > { %1008 = vst.msk [vmem:[#allocation3 + $0x38] sm:$0xff] %vm1000_vm11, %v991_v43  ;;  %1004 = vst.msk [vmem:[#allocation3 + $0x18] sm:$0xff] %vm1000_vm11, %v983_v35 }
 0x128   : > { %v2070_v39 = vld [vmem:[#allocation3 + $0x28] sm:$0xff]  ;;  %v1135_v48 = vpop.permute.xlu1 %1134  ;;  %v1127_v57 = vpop.permute.xlu0 %1126 }
 0x129   : > { %2656 = vmatmul.mubr.msk.bf16.vlgmr.msra.gmra.mrb[0].mxu1 %vm2100_vm4, %v2070_v39  ;;  %1153 = vst.msk [vmem:[#allocation3 + $0x30] sm:$0xff] %vm1146_vm12, %v1135_v48  ;;  %v2066_v46 = vld [vmem:[#allocation3 + $0x8] sm:$0xff]  ;;  %1149 = vst.msk [vmem:[#allocation3 + $0x10] sm:$0xff] %vm1146_vm12, %v1127_v57 }
 0x12a   : > { %2648 = vmatmul.mubr.msk.bf16.vlgmr.msra.gmra.mrb[0].mxu0 %vm2100_vm4, %v2066_v46 }
 0x12c   : > { %v1137_v50 = vpop.permute.xlu1 %1136  ;;  %v1129_v21 = vpop.permute.xlu0 %1128 }
 0x12d   : > { %1154 = vst.msk [vmem:[#allocation3 + $0x38] sm:$0xff] %vm1146_vm12, %v1137_v50  ;;  %1150 = vst.msk [vmem:[#allocation3 + $0x18] sm:$0xff] %vm1146_vm12, %v1129_v21 }
 0x130   : > { %v1228_v54 = vpop.permute.xlu1 %1227  ;;  %v1220_v52 = vpop.permute.xlu0 %1219 }
 0x131   : > { %1246 = vst.msk [vmem:[#allocation3 + $0x30] sm:$0xff] %vm1239_vm13, %v1228_v54  ;;  %1242 = vst.msk [vmem:[#allocation3 + $0x10] sm:$0xff] %vm1239_vm13, %v1220_v52 }
 0x134   : > { %v1230_v62 = vpop.permute.xlu1 %1229  ;;  %v1222_v63 = vpop.permute.xlu0 %1221 }
 0x135   : > { %1247 = vst.msk [vmem:[#allocation3 + $0x38] sm:$0xff] %vm1239_vm13, %v1230_v62  ;;  %1243 = vst.msk [vmem:[#allocation3 + $0x18] sm:$0xff] %vm1239_vm13, %v1222_v63 }
 0x138   : > { %v1445_v2 = vpop.permute.xlu1 %1444  ;;  %v1437_v18 = vpop.permute.xlu0 %1436 }
 0x139   : > { %1463 = vst.msk [vmem:[#allocation3 + $0x30] sm:$0xff] %vm1456_vm15, %v1445_v2  ;;  %1459 = vst.msk [vmem:[#allocation3 + $0x10] sm:$0xff] %vm1456_vm15, %v1437_v18 }
 0x13c   : > { %v1447_v15 = vpop.permute.xlu1 %1446  ;;  %v1439_v22 = vpop.permute.xlu0 %1438 }
 0x13d   : > { %1464 = vst.msk [vmem:[#allocation3 + $0x38] sm:$0xff] %vm1456_vm15, %v1447_v15  ;;  %1460 = vst.msk [vmem:[#allocation3 + $0x18] sm:$0xff] %vm1456_vm15, %v1439_v22 }
 0x140   : > { %v1590_v42 = vpop.permute.xlu1 %1589  ;;  %v1582_v1 = vpop.permute.xlu0 %1581 }
 0x141   : > { %1608 = vst.msk [vmem:[#allocation3 + $0x30] sm:$0xff] %vm1601_vm0, %v1590_v42  ;;  %1604 = vst.msk [vmem:[#allocation3 + $0x10] sm:$0xff] %vm1601_vm0, %v1582_v1 }
 0x144   : > { %v1592_v12 = vpop.permute.xlu1 %1591  ;;  %v1584_v55 = vpop.permute.xlu0 %1583 }
 0x145   : > { %1609 = vst.msk [vmem:[#allocation3 + $0x38] sm:$0xff] %vm1601_vm0, %v1592_v12  ;;  %1605 = vst.msk [vmem:[#allocation3 + $0x18] sm:$0xff] %vm1601_vm0, %v1584_v55 }
 0x148   : > { %v1683_v40 = vpop.permute.xlu1 %1682  ;;  %v1675_v32 = vpop.permute.xlu0 %1674 }
 0x149   : > { %1701 = vst.msk [vmem:[#allocation3 + $0x30] sm:$0xff] %vm1694_vm1, %v1683_v40  ;;  %1697 = vst.msk [vmem:[#allocation3 + $0x10] sm:$0xff] %vm1694_vm1, %v1675_v32 }
 0x14c   : > { %v1685_v61 = vpop.permute.xlu1 %1684  ;;  %v1677_v16 = vpop.permute.xlu0 %1676 }
 0x14d   : > { %1702 = vst.msk [vmem:[#allocation3 + $0x38] sm:$0xff] %vm1694_vm1, %v1685_v61  ;;  %1698 = vst.msk [vmem:[#allocation3 + $0x18] sm:$0xff] %vm1694_vm1, %v1677_v16 }
 0x150   : > { %v1900_v13 = vpop.permute.xlu1 %1899  ;;  %v1892_v19 = vpop.permute.xlu0 %1891 }
 0x151   : > { %1918 = vst.msk [vmem:[#allocation3 + $0x30] sm:$0xff] %vm1911_vm2, %v1900_v13  ;;  %1914 = vst.msk [vmem:[#allocation3 + $0x10] sm:$0xff] %vm1911_vm2, %v1892_v19 }
 0x154   : > { %v1902_v36 = vpop.permute.xlu1 %1901  ;;  %v1894_v47 = vpop.permute.xlu0 %1893 }
 0x155   : > { %1919 = vst.msk [vmem:[#allocation3 + $0x38] sm:$0xff] %vm1911_vm2, %v1902_v36  ;;  %1915 = vst.msk [vmem:[#allocation3 + $0x18] sm:$0xff] %vm1911_vm2, %v1894_v47 }
 0x158   : > { %v2045_v58 = vpop.permute.xlu1 %2044  ;;  %v2037_v3 = vpop.permute.xlu0 %2036 }
 0x159   : > { %2063 = vst.msk [vmem:[#allocation3 + $0x30] sm:$0xff] %vm2056_vm3, %v2045_v58  ;;  %2059 = vst.msk [vmem:[#allocation3 + $0x10] sm:$0xff] %vm2056_vm3, %v2037_v3 }
 0x15c   : > { %v2047_v11 = vpop.permute.xlu1 %2046  ;;  %v2039_v27 = vpop.permute.xlu0 %2038 }
 0x15d   : > { %2064 = vst.msk [vmem:[#allocation3 + $0x38] sm:$0xff] %vm2056_vm3, %v2047_v11  ;;  %2060 = vst.msk [vmem:[#allocation3 + $0x18] sm:$0xff] %vm2056_vm3, %v2039_v27 }
 0x160   : > { %v2071_v33 = vld [vmem:[#allocation3 + $0x30] sm:$0xff] }
 0x161   : > { %2659 = vmatprep.mubr.msk.bf16.mxu1 %vm2100_vm4, %v2071_v33  ;;  %v2067_v23 = vld [vmem:[#allocation3 + $0x10] sm:$0xff] }
 0x162   : > { %2651 = vmatprep.mubr.msk.bf16.mxu0 %vm2100_vm4, %v2067_v23 }
 0x164   : > { %v2072_v8 = vld [vmem:[#allocation3 + $0x38] sm:$0xff] }
 0x165   : > { %2660 = vmatmul.mubr.msk.bf16.gmra.mrb[4].mxu1 %vm2100_vm4, %v2072_v8  ;;  %v2068_v20 = vld [vmem:[#allocation3 + $0x18] sm:$0xff] }
 0x166   : > { %2652 = vmatmul.mubr.msk.bf16.gmra.mrb[4].mxu0 %vm2100_vm4, %v2068_v20 }
 0x1fc   : > { %v2657_v59 = vpop.f32.mrb[0].mxu1 }
 0x1fd   : > { %v2204_v44 = vadd.f32 %v2657_v59, %v2608_v37  ;;  %v2195_v31 = vpop.f32.mrb[1].mxu1  ;;  %v2649_v7 = vpop.f32.mrb[0].mxu0 }
 0x1fe   : > { %v2196_v24 = vadd.f32 %v2608_v37, %v2195_v31  ;;  %v2658_v5 = vpop.f32.mrb[2].mxu1  ;;  %v2172_v41 = vadd.f32 %v2649_v7, %v2608_v37  ;;  %v2163_v60 = vpop.f32.mrb[1].mxu0 }
 0x1ff   : > { %2236 = vst [vmem:[%s3795_s28 + $0x50] sm:$0xff] %v2204_v44  ;;  %v2207_v14 = vadd.f32 %v2658_v5, %v2608_v37  ;;  %v2198_v38 = vpop.f32.mrb[3].mxu1  ;;  %v2164_v45 = vadd.f32 %v2608_v37, %v2163_v60  ;;  %v2650_v9 = vpop.f32.mrb[2].mxu0 }
 0x200   : > { %2234 = vst [vmem:[%s3795_s28 + $0x40] sm:$0xff] %v2196_v24  ;;  %v2199_v56 = vadd.f32 %v2608_v37, %v2198_v38  ;;  %2228 = vst [vmem:[%s3795_s28 + $0x10] sm:$0xff] %v2172_v41  ;;  %v2175_v10 = vadd.f32 %v2650_v9, %v2608_v37  ;;  %v2166_v49 = vpop.f32.mrb[3].mxu0 }
 0x201   : > { %2237 = vst [vmem:[%s3795_s28 + $0x58] sm:$0xff] %v2207_v14  ;;  %2226 = vst [vmem:[%s3795_s28] sm:$0xff] %v2164_v45  ;;  %v2167_v53 = vadd.f32 %v2608_v37, %v2166_v49 }
 0x202   : > { %2235 = vst [vmem:[%s3795_s28 + $0x48] sm:$0xff] %v2199_v56  ;;  %2229 = vst [vmem:[%s3795_s28 + $0x18] sm:$0xff] %v2175_v10 }
 0x203   : > { %2227 = vst [vmem:[%s3795_s28 + $0x8] sm:$0xff] %v2167_v53 }
 0x238   : > { %v2661_v51 = vpop.f32.mrb[4].mxu1 }
 0x239   : > { %v2220_v4 = vadd.f32 %v2661_v51, %v2608_v37  ;;  %v2211_v17 = vpop.f32.mrb[5].mxu1  ;;  %v2653_v29 = vpop.f32.mrb[4].mxu0 }
 0x23a   : > { %v2212_v25 = vadd.f32 %v2608_v37, %v2211_v17  ;;  %v2662_v30 = vpop.f32.mrb[6].mxu1  ;;  %v2188_v34 = vadd.f32 %v2653_v29, %v2608_v37  ;;  %v2179_v28 = vpop.f32.mrb[5].mxu0 }
 0x23b   : > { %2240 = vst [vmem:[%s3795_s28 + $0x70] sm:$0xff] %v2220_v4  ;;  %v2223_v0 = vadd.f32 %v2662_v30, %v2608_v37  ;;  %v2214_v26 = vpop.f32.mrb[7].mxu1  ;;  %v2180_v6 = vadd.f32 %v2608_v37, %v2179_v28  ;;  %v2654_v43 = vpop.f32.mrb[6].mxu0 }
 0x23c   : > { %2238 = vst [vmem:[%s3795_s28 + $0x60] sm:$0xff] %v2212_v25  ;;  %v2215_v35 = vadd.f32 %v2608_v37, %v2214_v26  ;;  %2232 = vst [vmem:[%s3795_s28 + $0x30] sm:$0xff] %v2188_v34  ;;  %v2191_v39 = vadd.f32 %v2654_v43, %v2608_v37  ;;  %v2182_v48 = vpop.f32.mrb[7].mxu0 }
 0x23d   : > { %2241 = vst [vmem:[%s3795_s28 + $0x78] sm:$0xff] %v2223_v0  ;;  %2230 = vst [vmem:[%s3795_s28 + $0x20] sm:$0xff] %v2180_v6  ;;  %v2183_v57 = vadd.f32 %v2608_v37, %v2182_v48 }
 0x23e   : > { %2239 = vst [vmem:[%s3795_s28 + $0x68] sm:$0xff] %v2215_v35  ;;  %2233 = vst [vmem:[%s3795_s28 + $0x38] sm:$0xff] %v2191_v39 }
 0x23f   : > { %2231 = vst [vmem:[%s3795_s28 + $0x28] sm:$0xff] %v2183_v57 }
 0x240   : > { %2888 = shalt.err (!%p2885_p6)
}
 0x241   : > { %s2889_s10 = scalar_lea.hbm %s3815_s8, 2048  ;;  %s2893_s4 = scalar_lea.hbm %s3881_s3, 8192 }
 0x242   : > { %p2890_p7 = scmp.ne.s32.totalorder %s3815_s8, %s2889_s10  ;;  %p2894_p11 = scmp.lt.u32.totalorder %s3815_s8, %s3881_s3 }
 0x243   : > { %p2895_p12 = scmp.lt.u32.totalorder %s2893_s4, %s2889_s10  ;;  %p2897_p0 = scmp.lt.u32.totalorder %s2889_s10, %s3815_s8 }
 0x244   : > { %p2891_p9 = pnand %p2890_p7, %p3053_p3 }
 0x245   : > { %p2896_p13 = por %p2895_p12, %p2894_p11 }
 0x246   : > { %p2892_p10 = pneg %p2891_p9 }
 0x247   : > { %p2898_p1 = por %p2897_p0, %p2896_p13 }
 0x249   : > { %p2899_p2 = pnand %p2898_p1, %p2892_p10 }
 0x24b   : > { %2902 = shalt.err (!%p2899_p2)
}
 0x24c   : > { %s2981_s16 = smov 128  }
 0x24d   : > { %2671 = dma.vmem_to_hbm [thread:$0]  (%p3053_p3), %s3819_s15, 2048, %s3815_s8, %s3825_s9, %s2981_s16, %s2981_s16, %s2973_s20  }
 0x24e PF: > { %p2677_p4 = scmp.ge.s32.totalorder %s2969_s19, 2  ;;  %s2274_s7 = sand.u32 1, %s2941_s12  }
 0x24f   : > { %s2275_s11 = scalar_lea.sflag [#allocation5], %s2274_s7 }
 0x250   : > { %p2674_p5 = pnand %p2677_p4, %p3062_p8 }
 0x252   : > { %2936 = dma.done.wait (!%p2674_p5), %s2275_s11, 2048  }
 0x253   : > { %2938 = vsyncadd (!%p2674_p5), %s2275_s11, 4294965248  ;;  %s16_s19 = sadd.s32 1, %s2969_s19   ;;  %s3900_s12 = smov %s2945_s13 }
 0x254   : > { %p13_p6 = scmp.ge.s32.totalorder %s16_s19, 6   ;;  %s3901_s13 = smov %s2949_s14 }
 0x255   : > { %s3902_s14 = smov %s3071_s30  ;;  %s3903_s15 = smov %s2961_s17 }
 0x256   : > { %s3904_s16 = smov %s2965_s18  ;;  %s3905_s17 = smov %s3908_s22 }
 0x257   : > { %s3906_s18 = smov %s3912_s23  ;;  %15 = sbr.rel (!%p13_p6) target bundleno = 5 (0x5), region = 71 }
 0x25e   :  { %2280 = vsyncpa [#allocation5], 1 }
 0x25f   :  { %2282 = vsyncpa [#allocation5 + $0x1], 1 }

</bundles_post_ra>
